<compile_context>
chip_gen: v7x
topology: tpu7x:2x2x1
jax: 0.10.0
libtpu: 0.0.40
codegen_flags: <defaults>
</compile_context>

<pallas_src>
import functools
import math

import jax
import jax.numpy as jnp
from jax import lax
from jax.experimental import pallas as pl
from jax.experimental.pallas import tpu as pltpu


# contract the last axis of both operands, i.e. a @ b.T without a transpose
_DN_LAST = (((1,), (1,)), ((), ()))
_NEG_INF = -1e30


def _ctx2_kernel(c_ref, q_ref, mask_c_ref, wc_ref, wcq_ref, ctx2_ref, *,
                 mxu_dtype):
    """Per-batch pre-pass: ctx2 = softmax_c(S)^T @ c, shape (Qp, H).

    Needs the full C axis, so it runs once per batch element.  Q is small, so
    this kernel is tiny compared with the C-tiled main kernel.
    """
    c = c_ref[0]              # (Cp, H) f32
    q = q_ref[0]              # (Qp, H) f32
    mask_c = mask_c_ref[0]    # (1, Cp) f32 0/1
    wc = wc_ref[...]          # (1, H)
    wcq = wcq_ref[...]        # (1, H)
    f32 = jnp.float32

    cb = c.astype(mxu_dtype)
    qw = (q * wcq).astype(mxu_dtype)   # fold W_cq into the small operand q

    # Similarity directly in (Q, C) orientation -> softmax reduces on the lane
    # axis and the result is S2^T, exactly the layout needed for ctx2.
    # q@W_q and the bias b are constant along C and cancel exactly in the
    # masked softmax, so only the c@W_c row is needed (kept in f32, M=1).
    st_cq = lax.dot_general(qw, cb, _DN_LAST, preferred_element_type=f32)   # (Qp, Cp)
    s_c_row = lax.dot_general(wc, c, _DN_LAST, preferred_element_type=f32)  # (1, Cp)

    logits2 = jnp.where(mask_c > 0, st_cq + s_c_row, _NEG_INF)
    m2 = jnp.max(logits2, axis=1, keepdims=True)
    e2 = jnp.exp(logits2 - m2)
    # Exact divide (only Q rows) so S2 rows sum to 1 before feeding B = S1@ctx2.
    S2t = e2 / jnp.sum(e2, axis=1, keepdims=True)

    ctx2 = jnp.dot(S2t.astype(mxu_dtype), cb, preferred_element_type=f32)   # (Qp, H)
    ctx2_ref[0] = ctx2.astype(ctx2_ref.dtype)


def _attn_flow_kernel(c_ref, q_ref, ctx2_ref, mask_q_ref, wq_ref, wcq_ref,
                      g_ref, *, mxu_dtype):
    """C-tiled main kernel: S1 softmax, A = S1@q, B = S1@ctx2, slab stores."""
    H = c_ref.shape[-1]
    c = c_ref[0]              # (TC, H) f32
    q = q_ref[0]              # (Qp, H) f32
    ctx2 = ctx2_ref[0]        # (Qp, H) mxu_dtype
    mask_q = mask_q_ref[0]    # (1, Qp) f32 0/1
    wq = wq_ref[...]          # (1, H)
    wcq = wcq_ref[...]        # (1, H)
    f32 = jnp.float32

    cb = c.astype(mxu_dtype)
    qb = q.astype(mxu_dtype)
    qw = (q * wcq).astype(mxu_dtype)

    # c@W_c and the bias b are constant along the q axis -> cancel exactly in
    # this masked softmax; only q@W_q is needed (kept in f32, M=1).
    s_q_row = lax.dot_general(wq, q, _DN_LAST, preferred_element_type=f32)  # (1, Qp)
    s_cq = lax.dot_general(cb, qw, _DN_LAST, preferred_element_type=f32)    # (TC, Qp)

    logits1 = jnp.where(mask_q > 0, s_cq + s_q_row, _NEG_INF)
    m1 = jnp.max(logits1, axis=1, keepdims=True)
    e1 = jnp.exp(logits1 - m1)
    S1 = e1 * pl.reciprocal(jnp.sum(e1, axis=1, keepdims=True), approx=True)
    S1b = S1.astype(mxu_dtype)

    A = jnp.dot(S1b, qb, preferred_element_type=f32)      # (TC, H)
    # Padded-q columns of S1 are exactly zero, so padded ctx2 rows contribute 0.
    Bm = jnp.dot(S1b, ctx2, preferred_element_type=f32)   # (TC, H)

    # G = cat(c, A, c*A, c*B) along hidden, written as four lane-dense slabs.
    od = g_ref.dtype
    g_ref[0, :, 0:H] = c.astype(od)           # kept for module fidelity (pure copy)
    g_ref[0, :, H:2 * H] = A.astype(od)
    g_ref[0, :, 2 * H:3 * H] = (c * A).astype(od)
    g_ref[0, :, 3 * H:4 * H] = (c * Bm).astype(od)


def _round_up(x, m):
    return ((x + m - 1) // m) * m


def _pad_axis(x, axis, target):
    pad = target - x.shape[axis]
    if pad == 0:
        return x
    widths = [(0, 0)] * x.ndim
    widths[axis] = (0, pad)
    return jnp.pad(x, widths)


@functools.partial(jax.jit, static_argnames=("out_dtype", "mxu_dtype"))
def attn_flow(c, q, mask_c, mask_q, W_c, W_q, W_cq, b, *,
              out_dtype=None, mxu_dtype=jnp.bfloat16):
    """BiDAF attention flow: G = cat(c, A, c*A, c*B) along the hidden dim.

    out_dtype: dtype of G (pass jnp.bfloat16 to halve the dominant (C, 4H)
      HBM writeback); defaults to c.dtype.
    mxu_dtype: operand dtype for the large matmuls (accumulation is f32).
    """
    B, C, H = c.shape
    Q = q.shape[1]
    # b is constant over all of S, so it cancels exactly in both masked
    # softmaxes; the forward output does not depend on it.
    del b
    out_dtype = c.dtype if out_dtype is None else out_dtype

    # ---- padding (exactness preserved by masking / zero padding) -----------
    Qp = _round_up(Q, 128)                      # lane-dense softmax / MXU N dim
    n_ct = pl.cdiv(_round_up(C, 8), 512)        # balanced 8-aligned C tiles,
    TC = _round_up(pl.cdiv(C, n_ct), 8)         # at most ~512 rows each
    Cp = n_ct * TC

    c_p = _pad_axis(c, 1, Cp)
    q_p = _pad_axis(q, 1, Qp)
    mask_c_row = _pad_axis(mask_c.astype(jnp.float32), 1, Cp).reshape(B, 1, Cp)
    mask_q_row = _pad_axis(mask_q.astype(jnp.float32), 1, Qp).reshape(B, 1, Qp)
    wc_row = W_c.reshape(1, H)
    wq_row = W_q.reshape(1, H)
    wcq_row = W_cq.reshape(1, H)

    # ---- pre-pass: ctx2[b] = softmax_c(S[b])^T @ c[b]  -> (B, Qp, H) --------
    ctx2 = pl.pallas_call(
        functools.partial(_ctx2_kernel, mxu_dtype=mxu_dtype),
        out_shape=jax.ShapeDtypeStruct((B, Qp, H), mxu_dtype),
        grid=(B,),
        in_specs=[
            pl.BlockSpec((1, Cp, H), lambda i: (i, 0, 0)),   # c (full C axis)
            pl.BlockSpec((1, Qp, H), lambda i: (i, 0, 0)),   # q
            pl.BlockSpec((1, 1, Cp), lambda i: (i, 0, 0)),   # mask_c row
            pl.BlockSpec((1, H), lambda i: (0, 0)),          # W_c
            pl.BlockSpec((1, H), lambda i: (0, 0)),          # W_cq
        ],
        out_specs=pl.BlockSpec((1, Qp, H), lambda i: (i, 0, 0)),
        compiler_params=pltpu.CompilerParams(dimension_semantics=("parallel",)),
    )(c_p, q_p, mask_c_row, wc_row, wcq_row)

    # ---- main pass: C tiled; both grid axes parallel (megacore-friendly) ----
    G = pl.pallas_call(
        functools.partial(_attn_flow_kernel, mxu_dtype=mxu_dtype),
        out_shape=jax.ShapeDtypeStruct((B, Cp, 4 * H), out_dtype),
        grid=(B, Cp // TC),
        in_specs=[
            pl.BlockSpec((1, TC, H), lambda i, j: (i, j, 0)),   # c tile
            pl.BlockSpec((1, Qp, H), lambda i, j: (i, 0, 0)),   # q
            pl.BlockSpec((1, Qp, H), lambda i, j: (i, 0, 0)),   # ctx2
            pl.BlockSpec((1, 1, Qp), lambda i, j: (i, 0, 0)),   # mask_q row
            pl.BlockSpec((1, H), lambda i, j: (0, 0)),          # W_q
            pl.BlockSpec((1, H), lambda i, j: (0, 0)),          # W_cq
        ],
        out_specs=pl.BlockSpec((1, TC, 4 * H), lambda i, j: (i, j, 0)),
        compiler_params=pltpu.CompilerParams(
            dimension_semantics=("parallel", "parallel")),
    )(c_p, q_p, ctx2, mask_q_row, wq_row, wcq_row)

    if Cp != C:
        G = G[:, :C, :]
    return G


def reference_attn_flow(c, q, mask_c, mask_q, W_c, W_q, W_cq, b):
    """Pure-JAX reference mirroring the PyTorch forward (eval mode)."""
    S_c = jnp.matmul(c, W_c)                         # (B, C, 1)
    S_q = jnp.swapaxes(jnp.matmul(q, W_q), 1, 2)     # (B, 1, Q)
    S_cq = jnp.matmul(c * W_cq, jnp.swapaxes(q, 1, 2))
    S = S_c + S_q + S_cq + b                         # (B, C, Q)
    mq = mask_q[:, None, :].astype(jnp.float32)
    mc = mask_c[:, :, None].astype(jnp.float32)
    S1 = jax.nn.softmax(jnp.where(mq > 0, S, -1e30), axis=2)
    S2 = jax.nn.softmax(jnp.where(mc > 0, S, -1e30), axis=1)
    A = jnp.matmul(S1, q)
    Bm = jnp.matmul(jnp.matmul(S1, jnp.swapaxes(S2, 1, 2)), c)
    return jnp.concatenate([c, A, c * A, c * Bm], axis=2)


def kaiming_uniform(key, shape):
    """Deterministic kaiming_uniform_(mode='fan_in', nonlinearity='relu')."""
    if len(shape) == 2:
        fan_in = shape[1]
    else:
        fan_in = shape[1] * math.prod(shape[2:])
    bound = (6.0 / fan_in) ** 0.5
    return jax.random.uniform(key, shape, jnp.float32, -bound, bound)


if __name__ == "__main__":
    B, C_LEN, Q_LEN, H = 2, 16, 8, 32
    key = jax.random.PRNGKey(0)
    kc, kq, kwc, kwq, kwcq = jax.random.split(key, 5)

    c = jax.random.normal(kc, (B, C_LEN, H), jnp.float32)
    q = jax.random.normal(kq, (B, Q_LEN, H), jnp.float32)
    # masks: first rows valid, tail padded
    mask_c = (jnp.arange(C_LEN)[None, :] < jnp.array([[13], [16]])).astype(jnp.float32)
    mask_q = (jnp.arange(Q_LEN)[None, :] < jnp.array([[6], [8]])).astype(jnp.float32)

    # Parameters (deterministic init mimicking nn.init.kaiming_uniform_)
    W_c = kaiming_uniform(kwc, (H, 1))
    W_q = kaiming_uniform(kwq, (H, 1))
    W_cq = kaiming_uniform(kwcq, (1, 1, H))
    b = jnp.zeros((1,), jnp.float32)
    # TODO(synk): training-mode dropout (stochastic) not modeled; eval-mode identity used.

    G = attn_flow(c, q, mask_c, mask_q, W_c, W_q, W_cq, b)
    G = jax.block_until_ready(G)

    G_ref = reference_attn_flow(c, q, mask_c, mask_q, W_c, W_q, W_cq, b)
    assert G.shape == (B, C_LEN, 4 * H)
    assert G.dtype == c.dtype

    # Default path uses bf16 MXU operands + approx (EUP) reciprocal for the S1
    # softmax denominator, so validate with a normalized-error metric.
    diff = jnp.abs(G.astype(jnp.float32) - G_ref)
    scale = jnp.maximum(jnp.max(jnp.abs(G_ref)), 1.0)
    max_rel = float(jnp.max(diff) / scale)
    mean_rel = float(jnp.mean(diff) / scale)
    assert max_rel < 5e-2, f"max normalized error too large: {max_rel}"
    assert mean_rel < 5e-3, f"mean normalized error too large: {mean_rel}"

    # Full-f32 MXU path should be tight against the reference (approx
    # reciprocal in the S1 denominator is the only remaining approximation).
    G_f32 = attn_flow(c, q, mask_c, mask_q, W_c, W_q, W_cq, b,
                      mxu_dtype=jnp.float32)
    G_f32 = jax.block_until_ready(G_f32)
    assert jnp.allclose(G_f32, G_ref, atol=5e-3, rtol=5e-3)

    print("KERNEL_OK")
</pallas_src>

<mosaic_0001>
module attributes {stable_mosaic.version = 11 : i64} {
  func.func @_attn_flow_kernel(%arg0: i32, %arg1: i32, %arg2: memref<1x16x32xf32, #tpu.memory_space<vmem>>, %arg3: memref<1x128x32xf32, #tpu.memory_space<vmem>>, %arg4: memref<1x128x32xbf16, #tpu.memory_space<vmem>>, %arg5: memref<1x1x128xf32, #tpu.memory_space<vmem>>, %arg6: memref<1x32xf32, #tpu.memory_space<vmem>>, %arg7: memref<1x32xf32, #tpu.memory_space<vmem>>, %arg8: memref<1x16x128xf32, #tpu.memory_space<vmem>>) attributes {dimension_semantics = [#tpu.dimension_semantics<parallel>, #tpu.dimension_semantics<parallel>], iteration_bounds = array<i64: 2, 1>, scalar_prefetch = 0 : i64, scratch_operands = 0 : i64, tpu.core_type = #tpu.core_type<tc>, window_params = [{transform_indices = @transform_0, window_bounds = array<i64: 1, 16, 32>}, {transform_indices = @transform_1, window_bounds = array<i64: 1, 128, 32>}, {transform_indices = @transform_2, window_bounds = array<i64: 1, 128, 32>}, {transform_indices = @transform_3, window_bounds = array<i64: 1, 1, 128>}, {pipeline_mode = #tpu.pipeline_mode<synchronous>, transform_indices = @transform_4, window_bounds = array<i64: 1, 32>}, {pipeline_mode = #tpu.pipeline_mode<synchronous>, transform_indices = @transform_5, window_bounds = array<i64: 1, 32>}, {transform_indices = @transform_6, window_bounds = array<i64: 1, 16, 128>}]} {
    %c0 = arith.constant 0 : index
    %c0_0 = arith.constant 0 : index
    %c0_1 = arith.constant 0 : index
    %0 = vector.load %arg2[%c0, %c0_0, %c0_1] : memref<1x16x32xf32, #tpu.memory_space<vmem>>, vector<1x16x32xf32>
    %1 = vector.shape_cast %0 : vector<1x16x32xf32> to vector<16x32xf32>
    %c0_2 = arith.constant 0 : index
    %c0_3 = arith.constant 0 : index
    %c0_4 = arith.constant 0 : index
    %2 = vector.load %arg3[%c0_2, %c0_3, %c0_4] : memref<1x128x32xf32, #tpu.memory_space<vmem>>, vector<1x128x32xf32>
    %3 = vector.shape_cast %2 : vector<1x128x32xf32> to vector<128x32xf32>
    %c0_5 = arith.constant 0 : index
    %c0_6 = arith.constant 0 : index
    %c0_7 = arith.constant 0 : index
    %4 = vector.load %arg4[%c0_5, %c0_6, %c0_7] : memref<1x128x32xbf16, #tpu.memory_space<vmem>>, vector<1x128x32xbf16>
    %5 = vector.shape_cast %4 : vector<1x128x32xbf16> to vector<128x32xbf16>
    %c0_8 = arith.constant 0 : index
    %c0_9 = arith.constant 0 : index
    %c0_10 = arith.constant 0 : index
    %6 = vector.load %arg5[%c0_8, %c0_9, %c0_10] : memref<1x1x128xf32, #tpu.memory_space<vmem>>, vector<1x1x128xf32>
    %7 = vector.shape_cast %6 : vector<1x1x128xf32> to vector<1x128xf32>
    %c0_11 = arith.constant 0 : index
    %c0_12 = arith.constant 0 : index
    %8 = vector.load %arg6[%c0_11, %c0_12] : memref<1x32xf32, #tpu.memory_space<vmem>>, vector<1x32xf32>
    %c0_13 = arith.constant 0 : index
    %c0_14 = arith.constant 0 : index
    %9 = vector.load %arg7[%c0_13, %c0_14] : memref<1x32xf32, #tpu.memory_space<vmem>>, vector<1x32xf32>
    %10 = arith.truncf %1 : vector<16x32xf32> to vector<16x32xbf16>
    %11 = arith.truncf %3 : vector<128x32xf32> to vector<128x32xbf16>
    %12 = vector.broadcast %9 : vector<1x32xf32> to vector<128x32xf32>
    %13 = arith.mulf %3, %12 : vector<128x32xf32>
    %14 = arith.truncf %13 : vector<128x32xf32> to vector<128x32xbf16>
    %cst = arith.constant dense<0.000000e+00> : vector<1x128xf32>
    %15 = tpu.matmul %8, %3, %cst {dimension_numbers = #tpu.dot_dimension_numbers<[1], [1], [0], [0], [0, 0, 1, 0], [], []>} : vector<1x32xf32>, vector<128x32xf32>, vector<1x128xf32> -> vector<1x128xf32>
    %cst_15 = arith.constant dense<0.000000e+00> : vector<16x128xf32>
    %16 = tpu.matmul %10, %14, %cst_15 {dimension_numbers = #tpu.dot_dimension_numbers<[1], [1], [0], [0], [0, 0, 1, 0], [], []>} : vector<16x32xbf16>, vector<128x32xbf16>, vector<16x128xf32> -> vector<16x128xf32>
    %cst_16 = arith.constant 0.000000e+00 : f32
    %17 = vector.broadcast %cst_16 : f32 to vector<1x128xf32>
    %18 = arith.cmpf ogt, %7, %17 : vector<1x128xf32>
    %19 = vector.broadcast %15 : vector<1x128xf32> to vector<16x128xf32>
    %20 = arith.addf %16, %19 : vector<16x128xf32>
    %cst_17 = arith.constant -1.000000e+30 : f32
    %21 = vector.shape_cast %18 : vector<1x128xi1> to vector<1x128xi1>
    %22 = vector.broadcast %21 : vector<1x128xi1> to vector<16x128xi1>
    %23 = vector.broadcast %cst_17 : f32 to vector<16x128xf32>
    %24 = arith.select %22, %20, %23 : vector<16x128xi1>, vector<16x128xf32>
    %cst_18 = arith.constant dense<0xFF800000> : vector<16xf32>
    %25 = vector.multi_reduction <maximumf>, %24, %cst_18 [1] : vector<16x128xf32> to vector<16xf32>
    %26 = vector.shape_cast %25 : vector<16xf32> to vector<16x1xf32>
    %27 = vector.broadcast %26 : vector<16x1xf32> to vector<16x128xf32>
    %28 = arith.subf %24, %27 : vector<16x128xf32>
    %29 = math.exp %28 : vector<16x128xf32>
    %cst_19 = arith.constant dense<0.000000e+00> : vector<16xf32>
    %30 = vector.multi_reduction <add>, %29, %cst_19 [1] : vector<16x128xf32> to vector<16xf32>
    %31 = vector.shape_cast %30 : vector<16xf32> to vector<16x1xf32>
    %32 = tpu.reciprocal %31 {approx = true} : vector<16x1xf32> -> vector<16x1xf32>
    %33 = vector.broadcast %32 : vector<16x1xf32> to vector<16x128xf32>
    %34 = arith.mulf %29, %33 : vector<16x128xf32>
    %35 = arith.truncf %34 : vector<16x128xf32> to vector<16x128xbf16>
    %cst_20 = arith.constant dense<0.000000e+00> : vector<16x32xf32>
    %36 = tpu.matmul %35, %11, %cst_20 {dimension_numbers = #tpu.dot_dimension_numbers<[1], [0], [0], [1], [0, 0, 1, 1], [], []>} : vector<16x128xbf16>, vector<128x32xbf16>, vector<16x32xf32> -> vector<16x32xf32>
    %cst_21 = arith.constant dense<0.000000e+00> : vector<16x32xf32>
    %37 = tpu.matmul %35, %5, %cst_21 {dimension_numbers = #tpu.dot_dimension_numbers<[1], [0], [0], [1], [0, 0, 1, 1], [], []>} : vector<16x128xbf16>, vector<128x32xbf16>, vector<16x32xf32> -> vector<16x32xf32>
    %c0_22 = arith.constant 0 : index
    %c0_23 = arith.constant 0 : index
    %c0_24 = arith.constant 0 : index
    %38 = vector.load %arg8[%c0_22, %c0_23, %c0_24] : memref<1x16x128xf32, #tpu.memory_space<vmem>>, vector<1x16x32xf32>
    %39 = vector.shape_cast %38 : vector<1x16x32xf32> to vector<16x32xf32>
    %40 = vector.shape_cast %1 : vector<16x32xf32> to vector<1x16x32xf32>
    tpu.vector_store %arg8[%c0_22, %c0_23, %c0_24], %40 {strides = array<i32>} : memref<1x16x128xf32, #tpu.memory_space<vmem>>, vector<1x16x32xf32>,
    %c0_25 = arith.constant 0 : index
    %c0_26 = arith.constant 0 : index
    %c32 = arith.constant 32 : index
    %41 = vector.load %arg8[%c0_25, %c0_26, %c32] : memref<1x16x128xf32, #tpu.memory_space<vmem>>, vector<1x16x32xf32>
    %42 = vector.shape_cast %41 : vector<1x16x32xf32> to vector<16x32xf32>
    %43 = vector.shape_cast %36 : vector<16x32xf32> to vector<1x16x32xf32>
    tpu.vector_store %arg8[%c0_25, %c0_26, %c32], %43 {strides = array<i32>} : memref<1x16x128xf32, #tpu.memory_space<vmem>>, vector<1x16x32xf32>,
    %44 = arith.mulf %1, %36 : vector<16x32xf32>
    %c0_27 = arith.constant 0 : index
    %c0_28 = arith.constant 0 : index
    %c64 = arith.constant 64 : index
    %45 = vector.load %arg8[%c0_27, %c0_28, %c64] : memref<1x16x128xf32, #tpu.memory_space<vmem>>, vector<1x16x32xf32>
    %46 = vector.shape_cast %45 : vector<1x16x32xf32> to vector<16x32xf32>
    %47 = vector.shape_cast %44 : vector<16x32xf32> to vector<1x16x32xf32>
    tpu.vector_store %arg8[%c0_27, %c0_28, %c64], %47 {strides = array<i32>} : memref<1x16x128xf32, #tpu.memory_space<vmem>>, vector<1x16x32xf32>,
    %48 = arith.mulf %1, %37 : vector<16x32xf32>
    %c0_29 = arith.constant 0 : index
    %c0_30 = arith.constant 0 : index
    %c96 = arith.constant 96 : index
    %49 = vector.load %arg8[%c0_29, %c0_30, %c96] : memref<1x16x128xf32, #tpu.memory_space<vmem>>, vector<1x16x32xf32>
    %50 = vector.shape_cast %49 : vector<1x16x32xf32> to vector<16x32xf32>
    %51 = vector.shape_cast %48 : vector<16x32xf32> to vector<1x16x32xf32>
    tpu.vector_store %arg8[%c0_29, %c0_30, %c96], %51 {strides = array<i32>} : memref<1x16x128xf32, #tpu.memory_space<vmem>>, vector<1x16x32xf32>,
    return
  }
  func.func @transform_0(%arg0: i32, %arg1: i32) -> (i32, i32, i32) {
    %c0_i32 = arith.constant 0 : i32
    %c0_i32_0 = arith.constant 0 : i32
    return %arg0, %arg1, %c0_i32 : i32, i32, i32
  }
  func.func @transform_1(%arg0: i32, %arg1: i32) -> (i32, i32, i32) {
    %c0_i32 = arith.constant 0 : i32
    %c0_i32_0 = arith.constant 0 : i32
    %c0_i32_1 = arith.constant 0 : i32
    return %arg0, %c0_i32, %c0_i32_0 : i32, i32, i32
  }
  func.func @transform_2(%arg0: i32, %arg1: i32) -> (i32, i32, i32) {
    %c0_i32 = arith.constant 0 : i32
    %c0_i32_0 = arith.constant 0 : i32
    %c0_i32_1 = arith.constant 0 : i32
    return %arg0, %c0_i32, %c0_i32_0 : i32, i32, i32
  }
  func.func @transform_3(%arg0: i32, %arg1: i32) -> (i32, i32, i32) {
    %c0_i32 = arith.constant 0 : i32
    %c0_i32_0 = arith.constant 0 : i32
    %c0_i32_1 = arith.constant 0 : i32
    return %arg0, %c0_i32, %c0_i32_0 : i32, i32, i32
  }
  func.func @transform_4(%arg0: i32, %arg1: i32) -> (i32, i32) {
    %c0_i32 = arith.constant 0 : i32
    %c0_i32_0 = arith.constant 0 : i32
    %c0_i32_1 = arith.constant 0 : i32
    return %c0_i32, %c0_i32_0 : i32, i32
  }
  func.func @transform_5(%arg0: i32, %arg1: i32) -> (i32, i32) {
    %c0_i32 = arith.constant 0 : i32
    %c0_i32_0 = arith.constant 0 : i32
    %c0_i32_1 = arith.constant 0 : i32
    return %c0_i32, %c0_i32_0 : i32, i32
  }
  func.func @transform_6(%arg0: i32, %arg1: i32) -> (i32, i32, i32) {
    %c0_i32 = arith.constant 0 : i32
    %c0_i32_0 = arith.constant 0 : i32
    return %arg0, %arg1, %c0_i32 : i32, i32, i32
  }
}

module attributes {stable_mosaic.version = 11 : i64} {
  func.func @_ctx2_kernel(%arg0: i32, %arg1: memref<1x16x32xf32, #tpu.memory_space<vmem>>, %arg2: memref<1x128x32xf32, #tpu.memory_space<vmem>>, %arg3: memref<1x1x16xf32, #tpu.memory_space<vmem>>, %arg4: memref<1x32xf32, #tpu.memory_space<vmem>>, %arg5: memref<1x32xf32, #tpu.memory_space<vmem>>, %arg6: memref<1x128x32xbf16, #tpu.memory_space<vmem>>) attributes {dimension_semantics = [#tpu.dimension_semantics<parallel>], iteration_bounds = array<i64: 2>, scalar_prefetch = 0 : i64, scratch_operands = 0 : i64, tpu.core_type = #tpu.core_type<tc>, window_params = [{transform_indices = @transform_0, window_bounds = array<i64: 1, 16, 32>}, {transform_indices = @transform_1, window_bounds = array<i64: 1, 128, 32>}, {transform_indices = @transform_2, window_bounds = array<i64: 1, 1, 16>}, {pipeline_mode = #tpu.pipeline_mode<synchronous>, transform_indices = @transform_3, window_bounds = array<i64: 1, 32>}, {pipeline_mode = #tpu.pipeline_mode<synchronous>, transform_indices = @transform_4, window_bounds = array<i64: 1, 32>}, {transform_indices = @transform_5, window_bounds = array<i64: 1, 128, 32>}]} {
    %c0 = arith.constant 0 : index
    %c0_0 = arith.constant 0 : index
    %c0_1 = arith.constant 0 : index
    %0 = vector.load %arg1[%c0, %c0_0, %c0_1] : memref<1x16x32xf32, #tpu.memory_space<vmem>>, vector<1x16x32xf32>
    %1 = vector.shape_cast %0 : vector<1x16x32xf32> to vector<16x32xf32>
    %c0_2 = arith.constant 0 : index
    %c0_3 = arith.constant 0 : index
    %c0_4 = arith.constant 0 : index
    %2 = vector.load %arg2[%c0_2, %c0_3, %c0_4] : memref<1x128x32xf32, #tpu.memory_space<vmem>>, vector<1x128x32xf32>
    %3 = vector.shape_cast %2 : vector<1x128x32xf32> to vector<128x32xf32>
    %c0_5 = arith.constant 0 : index
    %c0_6 = arith.constant 0 : index
    %c0_7 = arith.constant 0 : index
    %4 = vector.load %arg3[%c0_5, %c0_6, %c0_7] : memref<1x1x16xf32, #tpu.memory_space<vmem>>, vector<1x1x16xf32>
    %5 = vector.shape_cast %4 : vector<1x1x16xf32> to vector<1x16xf32>
    %c0_8 = arith.constant 0 : index
    %c0_9 = arith.constant 0 : index
    %6 = vector.load %arg4[%c0_8, %c0_9] : memref<1x32xf32, #tpu.memory_space<vmem>>, vector<1x32xf32>
    %c0_10 = arith.constant 0 : index
    %c0_11 = arith.constant 0 : index
    %7 = vector.load %arg5[%c0_10, %c0_11] : memref<1x32xf32, #tpu.memory_space<vmem>>, vector<1x32xf32>
    %8 = arith.truncf %1 : vector<16x32xf32> to vector<16x32xbf16>
    %9 = vector.broadcast %7 : vector<1x32xf32> to vector<128x32xf32>
    %10 = arith.mulf %3, %9 : vector<128x32xf32>
    %11 = arith.truncf %10 : vector<128x32xf32> to vector<128x32xbf16>
    %cst = arith.constant dense<0.000000e+00> : vector<128x16xf32>
    %12 = tpu.matmul %11, %8, %cst {dimension_numbers = #tpu.dot_dimension_numbers<[1], [1], [0], [0], [0, 0, 1, 0], [], []>} : vector<128x32xbf16>, vector<16x32xbf16>, vector<128x16xf32> -> vector<128x16xf32>
    %cst_12 = arith.constant dense<0.000000e+00> : vector<1x16xf32>
    %13 = tpu.matmul %6, %1, %cst_12 {dimension_numbers = #tpu.dot_dimension_numbers<[1], [1], [0], [0], [0, 0, 1, 0], [], []>} : vector<1x32xf32>, vector<16x32xf32>, vector<1x16xf32> -> vector<1x16xf32>
    %cst_13 = arith.constant 0.000000e+00 : f32
    %14 = vector.broadcast %cst_13 : f32 to vector<1x16xf32>
    %15 = arith.cmpf ogt, %5, %14 : vector<1x16xf32>
    %16 = vector.broadcast %13 : vector<1x16xf32> to vector<128x16xf32>
    %17 = arith.addf %12, %16 : vector<128x16xf32>
    %cst_14 = arith.constant -1.000000e+30 : f32
    %18 = vector.shape_cast %15 : vector<1x16xi1> to vector<1x16xi1>
    %19 = vector.broadcast %18 : vector<1x16xi1> to vector<128x16xi1>
    %20 = vector.broadcast %cst_14 : f32 to vector<128x16xf32>
    %21 = arith.select %19, %17, %20 : vector<128x16xi1>, vector<128x16xf32>
    %cst_15 = arith.constant dense<0xFF800000> : vector<128xf32>
    %22 = vector.multi_reduction <maximumf>, %21, %cst_15 [1] : vector<128x16xf32> to vector<128xf32>
    %23 = vector.shape_cast %22 : vector<128xf32> to vector<128x1xf32>
    %24 = vector.broadcast %23 : vector<128x1xf32> to vector<128x16xf32>
    %25 = arith.subf %21, %24 : vector<128x16xf32>
    %26 = math.exp %25 : vector<128x16xf32>
    %cst_16 = arith.constant dense<0.000000e+00> : vector<128xf32>
    %27 = vector.multi_reduction <add>, %26, %cst_16 [1] : vector<128x16xf32> to vector<128xf32>
    %28 = vector.shape_cast %27 : vector<128xf32> to vector<128x1xf32>
    %29 = vector.broadcast %28 : vector<128x1xf32> to vector<128x16xf32>
    %30 = arith.divf %26, %29 : vector<128x16xf32>
    %31 = arith.truncf %30 : vector<128x16xf32> to vector<128x16xbf16>
    %cst_17 = arith.constant dense<0.000000e+00> : vector<128x32xf32>
    %32 = tpu.matmul %31, %8, %cst_17 {dimension_numbers = #tpu.dot_dimension_numbers<[1], [0], [0], [1], [0, 0, 1, 1], [], []>} : vector<128x16xbf16>, vector<16x32xbf16>, vector<128x32xf32> -> vector<128x32xf32>
    %33 = arith.truncf %32 : vector<128x32xf32> to vector<128x32xbf16>
    %c0_18 = arith.constant 0 : index
    %c0_19 = arith.constant 0 : index
    %c0_20 = arith.constant 0 : index
    %34 = vector.load %arg6[%c0_18, %c0_19, %c0_20] : memref<1x128x32xbf16, #tpu.memory_space<vmem>>, vector<1x128x32xbf16>
    %35 = vector.shape_cast %34 : vector<1x128x32xbf16> to vector<128x32xbf16>
    %36 = vector.shape_cast %33 : vector<128x32xbf16> to vector<1x128x32xbf16>
    tpu.vector_store %arg6[%c0_18, %c0_19, %c0_20], %36 {strides = array<i32>} : memref<1x128x32xbf16, #tpu.memory_space<vmem>>, vector<1x128x32xbf16>,
    return
  }
  func.func @transform_0(%arg0: i32) -> (i32, i32, i32) {
    %c0_i32 = arith.constant 0 : i32
    %c0_i32_0 = arith.constant 0 : i32
    %c0_i32_1 = arith.constant 0 : i32
    return %arg0, %c0_i32, %c0_i32_0 : i32, i32, i32
  }
  func.func @transform_1(%arg0: i32) -> (i32, i32, i32) {
    %c0_i32 = arith.constant 0 : i32
    %c0_i32_0 = arith.constant 0 : i32
    %c0_i32_1 = arith.constant 0 : i32
    return %arg0, %c0_i32, %c0_i32_0 : i32, i32, i32
  }
  func.func @transform_2(%arg0: i32) -> (i32, i32, i32) {
    %c0_i32 = arith.constant 0 : i32
    %c0_i32_0 = arith.constant 0 : i32
    %c0_i32_1 = arith.constant 0 : i32
    return %arg0, %c0_i32, %c0_i32_0 : i32, i32, i32
  }
  func.func @transform_3(%arg0: i32) -> (i32, i32) {
    %c0_i32 = arith.constant 0 : i32
    %c0_i32_0 = arith.constant 0 : i32
    %c0_i32_1 = arith.constant 0 : i32
    return %c0_i32, %c0_i32_0 : i32, i32
  }
  func.func @transform_4(%arg0: i32) -> (i32, i32) {
    %c0_i32 = arith.constant 0 : i32
    %c0_i32_0 = arith.constant 0 : i32
    %c0_i32_1 = arith.constant 0 : i32
    return %c0_i32, %c0_i32_0 : i32, i32
  }
  func.func @transform_5(%arg0: i32) -> (i32, i32, i32) {
    %c0_i32 = arith.constant 0 : i32
    %c0_i32_0 = arith.constant 0 : i32
    %c0_i32_1 = arith.constant 0 : i32
    return %arg0, %c0_i32, %c0_i32_0 : i32, i32, i32
  }
}

</mosaic_0001>

<bundles_post_ra>
// kernel: attn_flow.3
= control target key start
LH: loop header
LB: loop body
LE: loop exit
PB: predicated region body
PF: predicated region fallthrough
CT: control target
= control target key end

     0   :  { %11 = vsyncpa [#allocation3], 0  ;;  %s1654_s0 = inlined_call_operand.vmem [shape: f32[2,16,32], index: 0, kind: input, shape index: {}]   ;;  %s1655_s1 = inlined_call_operand.vmem [shape: f32[2,128,32], index: 1, kind: input, shape index: {}]   ;;  %s1656_s2 = inlined_call_operand.vmem [shape: bf16[2,128,32], index: 2, kind: input, shape index: {}]   ;;  %s1657_s3 = inlined_call_operand.vmem [shape: f32[2,1,128], index: 3, kind: input, shape index: {}]   ;;  %s1658_s4 = inlined_call_operand.vmem [shape: f32[1,32], index: 4, kind: input, shape index: {}]   ;;  %s1659_s5 = inlined_call_operand.vmem [shape: f32[1,32], index: 5, kind: input, shape index: {}]   ;;  %s1660_s6 = inlined_call_operand.hbm [shape: f32[2,16,128], index: 6, kind: output, shape index: {}]  }
   0x1   :  { %13 = vsyncpa [#allocation3 + $0x1], 0  ;;  %s1355_s21 = smov 0   ;;  %s1357_s22 = smov 0  }
   0x2   :  { %s1359_s23 = smov 0   ;;  %s1361_s24 = smov 0  }
   0x3   :  { %s1363_s25 = smov 0   ;;  %s1365_s26 = smov 0  }
   0x4 LB: > { %s931_s27 = sadd.s32 4294967295, %s1308_s26   ;;  %s932_s28 = sadd.s32 4294967294, %s1308_s26   ;;  %s1308_s26 = sphi %s1365_s26, %s19_s26   ;;  %s1304_s25 = sphi %s1363_s25, %s1669_s25   ;;  %s1300_s24 = sphi %s1361_s24, %s1668_s24   ;;  %s1296_s23 = sphi %s1359_s23, %s1667_s23   ;;  %s1292_s22 = sphi %s1357_s22, %s1666_s22   ;;  %s1288_s21 = sphi %s1355_s21, %s1665_s21  }
   0x5   : > { %s31_s29 = sadd.s32 1, %s1304_s25  ;;  %s188_s30 = sadd.s32 1, %s1296_s23 }
   0x6   : > { %p33_p0 = scmp.ge.s32.totalorder %s31_s29, 2  ;;  %p198_p1 = scmp.ne.s32.totalorder %s1296_s23, %s1292_s22 }
   0x7   : > { %p199_p2 = scmp.eq.s32.totalorder %s931_s27, 1  ;;  %p204_p3 = scmp.ne.s32.totalorder %s1292_s22, %s1288_s21 }
   0x8   : > { %s1671_s29 = smov (%p33_p0, %s31_s29), 0  ;;  %p205_p5 = scmp.eq.s32.totalorder %s932_s28, 1 }
   0x9   : > { %p1395_p4 = por %p199_p2, %p198_p1  ;;  %s183_s8 = ssub.s32 %s1304_s25, %s1671_s29 }
   0xa   : > { %p935_p6 = scmp.ge.s32.totalorder %s1308_s26, 1  ;;  %p186_p7 = scmp.eq.s32.totalorder %s183_s8, 0 }
   0xb   : > { %p1402_p8 = por %p205_p5, %p204_p3  ;;  %p264_p9 = scmp.lt.s32.totalorder %s1308_s26, 3 }
   0xc   : > { %s1408_s10 = scalar_select %p186_p7, %s1296_s23, %s188_s30  }
   0xd   : > { %p265_p10 = pnand %p935_p6, %p264_p9 }
   0xe   : > { %p312_p11 = scmp.lt.s32.totalorder (!%p265_p10), %s1300_s24, 1  ;;  %v1310_v0 = vmov (!%p265_p10), 0.0|0.0   ;;  %v1311_v1 = vmov (!%p265_p10), 0.0   ;;  %vm412_vm0 = vcmask (!%p265_p10), 261120   ;;  %vm1312_vm1 = vmmov (!%p265_p10), 0   ;;  %s1314_s20 = smov (!%p265_p10), 32  }
   0xf   : > { %268 = sbr.rel (%p265_p10) target bundleno = 984 (0x3d8), region = 44  ;;  %1118 = vmatprep.subr.bf16.mxu0 (!%p265_p10), %v1310_v0  ;;  %1058 = vmatprep.subr.bf16.mxu1 (!%p265_p10), %v1311_v1  ;;  %v1424_v2 = vld [vmem:[%s1659_s5] ss:$0 sm:$0xff] (!%p265_p10)  ;;  %vm1433_vm2 = vmpackc.low (!%p265_p10), %vm412_vm0, %vm412_vm0  ;;  %s1316_s28 = smov (!%p265_p10), 64   ;;  %vm774_vm5 = vcmask (!%p265_p10), 523520   ;;  %vm787_vm6 = vcmask (!%p265_p10), 785920  }
  0x10   : > { %1055 = vmatprep.mubr.msk.f32.mxu0 (!%p265_p10), %vm1312_vm1, %v1311_v1  ;;  %1074 = vmatprep.mubr.msk.bf16.mxu1 (!%p265_p10), %vm1312_vm1, %v1311_v1  ;;  %v371_v62 = vld [vmem:[%s1658_s4] sm:$0x1] (!%p265_p10)  ;;  %vm800_vm7 = vcmask (!%p265_p10), 1048320   ;;  %s978_s30 = sshll.u32 (!%p265_p10), %s1300_s24, 8 }
  0x16   : > { %s1414_s11 = scalar_select %p312_p11, %s1300_s24, 1 }
  0x17   : > { %s1317_s24 = smov [#allocation2]  }
  0x18   : > { %s976_s12 = sshll.u32 %s1414_s11, 7  ;;  %s975_s18 = sshll.u32 %s1414_s11, 4 }
  0x19   : > { %s1429_s17 = scalar_lea.vmem %s1655_s1, %s976_s12  ;;  %s319_s27 = scalar_lea.vmem %s1654_s0, %s975_s18 }
  0x1a   : > { %v338_v4 = vld [vmem:[%s1429_s17] sm:$0xff]  ;;  %v339_v5 = vld [vmem:[%s1429_s17 + $0x8] sm:$0xff]  ;;  %v340_v6 = vld [vmem:[%s1429_s17 + $0x10] sm:$0xff]  ;;  %s333_s13 = scalar_lea.vmem %s1657_s3, %s1414_s11  ;;  %s977_s14 = sshll.u32 %s1414_s11, 6 }
  0x1b   : > { %v1440_v7 = vpack.c.bf16 %v339_v5, %v338_v4  ;;  %v388_v8 = vmul.f32 %v1424_v2, %v338_v4  ;;  %v389_v9 = vmul.f32 %v1424_v2, %v339_v5  ;;  %v341_v10 = vld [vmem:[%s1429_s17 + $0x18] sm:$0xff]  ;;  %v390_v12 = vmul.f32 %v1424_v2, %v340_v6  ;;  %v342_v17 = vld [vmem:[%s1429_s17 + $0x20] sm:$0xff]  ;;  %v343_v18 = vld [vmem:[%s1429_s17 + $0x28] sm:$0xff]  ;;  %s308_s11 = sand.u32 1, %s1292_s22  }
  0x1c   : > { %v391_v13 = vmul.f32 %v1424_v2, %v341_v10  ;;  %v1452_v15 = vpack.c.bf16 %v341_v10, %v340_v6  ;;  %v392_v20 = vmul.f32 %v1424_v2, %v342_v17  ;;  %v393_v21 = vmul.f32 %v1424_v2, %v343_v18  ;;  %v344_v24 = vld [vmem:[%s1429_s17 + $0x30] sm:$0xff]  ;;  %v345_v25 = vld [vmem:[%s1429_s17 + $0x38] sm:$0xff]  ;;  %v346_v31 = vld [vmem:[%s1429_s17 + $0x40] sm:$0xff]  ;;  %s936_s18 = sshll.u32 %s308_s11, 4  ;;  %s1608_s15 = scalar_lea.sflag [#allocation3], %s308_s11 }
  0x1d   : > { %1121 = vmatpush3.bf16.xpose.msk.msra.mxu0 %vm1433_vm2, %v1440_v7  ;;  %v404_v11 = vpack.c.bf16 %v389_v9, %v388_v8  ;;  %v1464_v22 = vpack.c.bf16 %v343_v18, %v342_v17  ;;  %v394_v27 = vmul.f32 %v1424_v2, %v344_v24  ;;  %v395_v28 = vmul.f32 %v1424_v2, %v345_v25  ;;  %v347_v32 = vld [vmem:[%s1429_s17 + $0x48] sm:$0xff]  ;;  %v348_v38 = vld [vmem:[%s1429_s17 + $0x50] sm:$0xff]  ;;  %v349_v39 = vld [vmem:[%s1429_s17 + $0x58] sm:$0xff]  ;;  %s1579_s19 = scalar_lea.vmem [#allocation2], %s936_s18 }
  0x1e   : > { %1122 = vmatprep.subr.bf16.mxu0 %v1310_v0  ;;  %v405_v16 = vpack.c.bf16 %v391_v13, %v390_v12  ;;  %v406_v23 = vpack.c.bf16 %v393_v21, %v392_v20  ;;  %v1476_v29 = vpack.c.bf16 %v345_v25, %v344_v24  ;;  %v396_v34 = vmul.f32 %v1424_v2, %v346_v31  ;;  %v350_v45 = vld [vmem:[%s1429_s17 + $0x60] sm:$0xff]  ;;  %v351_v46 = vld [vmem:[%s1429_s17 + $0x68] sm:$0xff]  ;;  %v352_v52 = vld [vmem:[%s1429_s17 + $0x70] sm:$0xff]  ;;  %s819_s8 = sshll.u32 %s1579_s19, 4  ;;  %s1603_s8 = int_to_ptr.vmem [resolvable:$true] %s819_s8 }
  0x1f   : > { %v543_v14 = vsel %vm412_vm0, %v404_v11, 0  ;;  %v407_v30 = vpack.c.bf16 %v395_v28, %v394_v27  ;;  %v397_v35 = vmul.f32 %v1424_v2, %v347_v32  ;;  %v378_v36 = vpack.c.bf16 %v347_v32, %v346_v31  ;;  %v353_v53 = vld [vmem:[%s1429_s17 + $0x78] sm:$0xff]  ;;  %v1524_v60 = vld [vmem:[%s319_s27] sm:$0xff]  ;;  %v1526_v61 = vld [vmem:[%s319_s27 + $0x8] sm:$0xff]  ;;  %s1559_s17 = scalar_lea.vmem %s1656_s2, %s977_s14  ;;  %s1315_s27 = smov 96  }
  0x20   : > { %1059 = vmatpush3.bf16.xpose.msra.mxu1 %v543_v14  ;;  %v546_v19 = vsel %vm412_vm0, %v405_v16, 0  ;;  %v549_v26 = vsel %vm412_vm0, %v406_v23, 0  ;;  %v398_v41 = vmul.f32 %v1424_v2, %v348_v38  ;;  %v399_v42 = vmul.f32 %v1424_v2, %v349_v39  ;;  %v1215_v20 = vld [vmem:[%s1559_s17 + $0x8] sm:$0xff]   ;;  %v1216_v21 = vld [vmem:[%s1559_s17 + $0x10] sm:$0xff]   ;;  %v1218_v31 = vld [vmem:[%s1559_s17 + $0x20] sm:$0xff]   ;;  %764 = vst.msk [vmem:[%s1579_s19] sm:$0xff] %vm412_vm0, %v1524_v60  ;;  %s1601_s14 = scalar_lea.hbm %s1660_s6, %s978_s30 }
  0x21   : > { %1060 = vmatprep.subr.bf16.mxu1 %v1311_v1  ;;  %v552_v33 = vsel %vm412_vm0, %v407_v30, 0  ;;  %v408_v37 = vpack.c.bf16 %v397_v35, %v396_v34  ;;  %v379_v43 = vpack.c.bf16 %v349_v39, %v348_v38  ;;  %v400_v48 = vmul.f32 %v1424_v2, %v350_v45  ;;  %v1217_v30 = vld [vmem:[%s1559_s17 + $0x18] sm:$0xff]   ;;  %v1219_v32 = vld [vmem:[%s1559_s17 + $0x28] sm:$0xff]   ;;  %765 = vst.msk [vmem:[%s1579_s19 + $0x8] sm:$0xff] %vm412_vm0, %v1526_v61  ;;  %s1230_s16 = scalar_lea.vmem %s1603_s8, 256 }
  0x22   : > { %v409_v44 = vpack.c.bf16 %v399_v42, %v398_v41  ;;  %v401_v49 = vmul.f32 %v1424_v2, %v351_v46  ;;  %v380_v50 = vpack.c.bf16 %v351_v46, %v350_v45  ;;  %v402_v55 = vmul.f32 %v1424_v2, %v352_v52  ;;  %v1221_v34 = vld [vmem:[%s1559_s17 + $0x38] sm:$0xff]   ;;  %p1231_p12 = scmp.ne.s32.totalorder %s1603_s8, %s1230_s16 }
  0x23   : > { %v555_v40 = vsel %vm412_vm0, %v408_v37, 0  ;;  %v403_v56 = vmul.f32 %v1424_v2, %v353_v53  ;;  %v381_v57 = vpack.c.bf16 %v353_v53, %v352_v52  ;;  %v373_v63 = vpack.c.bf16 %v1526_v61, %v1524_v60  ;;  %v370_v2 = vld [vmem:[%s333_s13] sm:$0x1] }
  0x24   : > { %v558_v47 = vsel %vm412_vm0, %v409_v44, 0  ;;  %v410_v51 = vpack.c.bf16 %v401_v49, %v400_v48  ;;  %vm534_vm3 = vcmp.gt.f32.partialorder %v370_v2, 0.0  ;;  %v1313_v5 = vmov 0   ;;  %p1232_p13 = pnand %p1231_p12, %p1395_p4 }
  0x25   : > { %1125 = vmatpush3.bf16.xpose.msk.msra.mxu0 %vm1433_vm2, %v1452_v15  ;;  %v411_v58 = vpack.c.bf16 %v403_v56, %v402_v55  ;;  %v607_v6 = vsel %vm534_vm3, 1, %v1313_v5 }
  0x26   : > { %1126 = vmatprep.subr.bf16.mxu0 %v1310_v0  ;;  %v561_v54 = vsel %vm412_vm0, %v410_v51, 0  ;;  %p1233_p0 = pneg %p1232_p13 }
  0x27   : > { %v564_v59 = vsel %vm412_vm0, %v411_v58, 0 }
  0x28   : > { %1061 = vmatpush3.bf16.xpose.msra.mxu1 %v546_v19  ;;  %v1214_v19 = vld [vmem:[%s1559_s17] sm:$0xff]  }
  0x29   : > { %1062 = vmatprep.subr.bf16.mxu1 %v1311_v1 }
  0x2d   : > { %1129 = vmatpush3.bf16.xpose.msk.msra.mxu0 %vm1433_vm2, %v1464_v22 }
  0x2e   : > { %1130 = vmatprep.subr.bf16.mxu0 %v1310_v0 }
  0x30   : > { %1063 = vmatpush3.bf16.xpose.msra.mxu1 %v549_v26 }
  0x31   : > { %1064 = vmatprep.subr.bf16.mxu1 %v1311_v1 }
  0x35   : > { %1133 = vmatpush3.bf16.xpose.msk.msra.mxu0 %vm1433_vm2, %v1476_v29 }
  0x36   : > { %1134 = vmatprep.subr.bf16.mxu0 %v1310_v0 }
  0x38   : > { %1065 = vmatpush3.bf16.xpose.msra.mxu1 %v552_v33  ;;  %v1220_v33 = vld [vmem:[%s1559_s17 + $0x30] sm:$0xff]   ;;  %s1234_s17 = sshll.u32 %s1317_s24, 4  ;;  %s1235_s17 = int_to_ptr.vmem [resolvable:$false] %s1234_s17 }
  0x39   : > { %1066 = vmatprep.subr.bf16.mxu1 %v1311_v1  ;;  %s1236_s18 = scalar_lea.vmem %s1235_s17, 512  ;;  %p1237_p1 = scmp.lt.s32.totalorder %s1603_s8, %s1235_s17 }
  0x3a   : > { %p1238_p2 = scmp.lt.s32.totalorder %s1236_s18, %s1230_s16 }
  0x3c   : > { %p1239_p3 = por %p1238_p2, %p1237_p1 }
  0x3d   : > { %1137 = vmatpush3.bf16.xpose.msk.msra.mxu0 %vm1433_vm2, %v378_v36 }
  0x3e   : > { %1138 = vmatprep.subr.bf16.mxu0 %v1310_v0  ;;  %p1240_p5 = pnand %p1239_p3, %p1233_p0 }
  0x40   : > { %1067 = vmatpush3.bf16.xpose.msra.mxu1 %v555_v40 }
  0x41   : > { %1068 = vmatprep.subr.bf16.mxu1 %v1311_v1 }
  0x45   : > { %1141 = vmatpush3.bf16.xpose.msk.msra.mxu0 %vm1433_vm2, %v379_v43 }
  0x46   : > { %1142 = vmatprep.subr.bf16.mxu0 %v1310_v0 }
  0x48   : > { %1069 = vmatpush3.bf16.xpose.msra.mxu1 %v558_v47 }
  0x49   : > { %1070 = vmatprep.subr.bf16.mxu1 %v1311_v1 }
  0x4d   : > { %1145 = vmatpush3.bf16.xpose.msk.msra.mxu0 %vm1433_vm2, %v380_v50 }
  0x4e   : > { %1146 = vmatprep.subr.bf16.mxu0 %v1310_v0  ;;  %v535_v0 = vlaneseq }
  0x50   : > { %1071 = vmatpush3.bf16.xpose.msra.mxu1 %v561_v54  ;;  %v536_v3 = vshrl.u32 %v535_v0, 7 }
  0x51   : > { %1072 = vmatprep.subr.bf16.mxu1 %v1311_v1 }
  0x52   : > { %v537_v4 = vsub.s32 0, %v536_v3 }
  0x55   : > { %1149 = vmatpush3.bf16.xpose.msk.msra.mxu0 %vm1433_vm2, %v381_v57 }
  0x56   : > { %1078 = vmatprep.subr.bf16.mxu0 %v1311_v1 }
  0x58   : > { %1073 = vmatpush3.bf16.xpose.msra.mxu1 %v564_v59 }
  0x59   : > { %1098 = vmatprep.subr.bf16.mxu1 %v1311_v1 }
  0x5c   : > { %1056 = vmatmul.mubr.msk.f32.vlgmr.msra.gmra.mrb[0].mxu0 %vm412_vm0, %v371_v62 }
  0x5d   : > { %1079 = vmatpush3.bf16.msra.mxu0 %v1440_v7  ;;  %1094 = vmatprep.mubr.msk.bf16.mxu0 %vm1312_vm1, %v1311_v1  ;;  %v611_v7 = vrot.slane %v607_v6, %v537_v4 }
  0x5e   : > { %1080 = vmatprep.subr.bf16.mxu0 %v1311_v1 }
  0x5f   : > { %1075 = vmatmul.mubr.msk.bf16.vlgmr.msra.gmra.mrb[0].mxu1 %vm412_vm0, %v373_v63  ;;  %vm612_vm4 = vcmp.eq.s32.totalorder %v611_v7, 1 }
  0x60   : > { %1114 = vmatprep.mubr.msk.bf16.mxu1 %vm1312_vm1, %v1311_v1  ;;  %1099 = vmatpush3.bf16.msra.mxu1 %v1214_v19 }
  0x61   : > { %1081 = vmatpush3.bf16.msra.mxu0 %v1452_v15  ;;  %1100 = vmatprep.subr.bf16.mxu1 %v1311_v1 }
  0x62   : > { %1082 = vmatprep.subr.bf16.mxu0 %v1311_v1 }
  0x64   : > { %1101 = vmatpush3.bf16.msra.mxu1 %v1215_v20 }
  0x65   : > { %1083 = vmatpush3.bf16.msra.mxu0 %v1464_v22  ;;  %1102 = vmatprep.subr.bf16.mxu1 %v1311_v1 }
  0x66   : > { %1084 = vmatprep.subr.bf16.mxu0 %v1311_v1 }
  0x68   : > { %1103 = vmatpush3.bf16.msra.mxu1 %v1216_v21 }
  0x69   : > { %1085 = vmatpush3.bf16.msra.mxu0 %v1476_v29  ;;  %1104 = vmatprep.subr.bf16.mxu1 %v1311_v1 }
  0x6a   : > { %1086 = vmatprep.subr.bf16.mxu0 %v1311_v1 }
  0x6c   : > { %1105 = vmatpush3.bf16.msra.mxu1 %v1217_v30 }
  0x6d   : > { %1087 = vmatpush3.bf16.msra.mxu0 %v378_v36  ;;  %1106 = vmatprep.subr.bf16.mxu1 %v1311_v1 }
  0x6e   : > { %1088 = vmatprep.subr.bf16.mxu0 %v1311_v1 }
  0x70   : > { %1107 = vmatpush3.bf16.msra.mxu1 %v1218_v31 }
  0x71   : > { %1089 = vmatpush3.bf16.msra.mxu0 %v379_v43  ;;  %1108 = vmatprep.subr.bf16.mxu1 %v1311_v1 }
  0x72   : > { %1090 = vmatprep.subr.bf16.mxu0 %v1311_v1 }
  0x74   : > { %1109 = vmatpush3.bf16.msra.mxu1 %v1219_v32 }
  0x75   : > { %1091 = vmatpush3.bf16.msra.mxu0 %v380_v50  ;;  %1110 = vmatprep.subr.bf16.mxu1 %v1311_v1 }
  0x76   : > { %1092 = vmatprep.subr.bf16.mxu0 %v1311_v1 }
  0x78   : > { %1111 = vmatpush3.bf16.msra.mxu1 %v1220_v33 }
  0x79   : > { %1093 = vmatpush3.bf16.msra.mxu0 %v381_v57  ;;  %1112 = vmatprep.subr.bf16.mxu1 %v1311_v1 }
  0x7c   : > { %1113 = vmatpush3.bf16.msra.mxu1 %v1221_v34 }
 0x12f   : > { %v530_v8 = vpop.f32.mrb[0].mxu0 }
 0x130   : > { %v538_v9 = vrot.slane %v530_v8, %v537_v4  ;;  %v1057_v10 = vpop.f32.mrb[1].mxu0 }
 0x132   : > { %v600_v11 = vpop.f32.mrb[0].mxu1 }
 0x133   : > { %v601_v12 = vadd.f32 %v600_v11, %v538_v9  ;;  %v1076_v13 = vpop.f32.mrb[1].mxu1 }
 0x134   : > { %v603_v14 = vpop.f32.mrb[2].mxu1 }
 0x135   : > { %v604_v15 = vadd.f32 %v603_v14, %v538_v9  ;;  %v1077_v16 = vpop.f32.mrb[3].mxu1  ;;  %v613_v17 = vsel %vm612_vm4, %v601_v12, -1e+30 }
 0x136   : > { %615 = vmax.xlane.f32.xlu0 %v613_v17 }
 0x137   : > { %v614_v18 = vsel %vm612_vm4, %v604_v15, -1e+30 }
 0x13a   : > { %617 = vmax.xlane.f32.xlu0 %v614_v18 }
 0x1c3   : > { %v616_v22 = vpop.xlane.xlu0 %615 }
 0x1c4   : > { %v619_v23 = vsub.f32 %v613_v17, %v616_v22 }
 0x1c6   : > { %v621_v24 = vmul.f32 1.442695, %v619_v23 }
 0x1c7   : > { %v618_v25 = vpop.xlane.xlu0 %617 }
 0x1c8   : > { %1222 = vpow2.f32 %v621_v24  ;;  %v620_v26 = vsub.f32 %v614_v18, %v618_v25 }
 0x1ca   : > { %v623_v27 = vmul.f32 1.442695, %v620_v26 }
 0x1cc   : > { %1224 = vpow2.f32 %v623_v27 }
 0x1d2   : > { %v1223_v28 = vpop.eup %1222 }
 0x1d3   : > { %625 = vadd.xlane.f32.xlu1 %v1223_v28 }
 0x1d6   : > { %v1225_v29 = vpop.eup %1224 }
 0x1d7   : > { %627 = vadd.xlane.f32.xlu1 %v1225_v29 }
 0x260   : > { %v626_v35 = vpop.xlane.xlu1 %625 }
 0x261   : > { %1226 = vrcp.f32 %v626_v35 }
 0x264   : > { %v628_v36 = vpop.xlane.xlu1 %627 }
 0x265   : > { %1228 = vrcp.f32 %v628_v36 }
 0x26b   : > { %v1227_v37 = vpop.eup %1226 }
 0x26c   : > { %v631_v39 = vmul.f32 %v1227_v37, %v1223_v28 }
 0x26f   : > { %v1229_v38 = vpop.eup %1228 }
 0x270   : > { %v632_v40 = vmul.f32 %v1229_v38, %v1225_v29 }
 0x272   : > { %v633_v41 = vpack.c.bf16 %v632_v40, %v631_v39 }
 0x274   : > { %1095 = vmatmul.mubr.bf16.vlgmr.msra.gmra.mrb[4].mxu0 %v633_v41  ;;  %1115 = vmatmul.mubr.bf16.vlgmr.msra.gmra.mrb[4].mxu1 %v633_v41 }
 0x347   : > { %v668_v1 = vpop.f32.mrb[4].mxu0  ;;  %v757_v42 = vpop.f32.mrb[4].mxu1 }
 0x348   : > { %768 = vrot.lane.b32.xlu0 %v668_v1, %s1314_s20  ;;  %v1096_v43 = vpop.f32.mrb[5].mxu0  ;;  %v1116_v44 = vpop.f32.mrb[5].mxu1  ;;  %v790_v47 = vmul.f32 %v757_v42, %v1524_v60  ;;  %v777_v50 = vmul.f32 %v668_v1, %v1524_v60 }
 0x349   : > { %v671_v45 = vpop.f32.mrb[6].mxu0  ;;  %v760_v46 = vpop.f32.mrb[6].mxu1 }
 0x34a   : > { %770 = vrot.lane.b32.xlu1 %v671_v45, %s1314_s20  ;;  %v1097_v48 = vpop.f32.mrb[7].mxu0  ;;  %v1117_v49 = vpop.f32.mrb[7].mxu1  ;;  %v778_v51 = vmul.f32 %v671_v45, %v1526_v61  ;;  %v791_v52 = vmul.f32 %v760_v46, %v1526_v61 }
 0x34c   : > { %794 = vrot.lane.b32.xlu0 %v790_v47, %s1315_s27 }
 0x34e   : > { %781 = vrot.lane.b32.xlu1 %v777_v50, %s1316_s28 }
 0x352   : > { %783 = vrot.lane.b32.xlu1 %v778_v51, %s1316_s28 }
 0x356   : > { %796 = vrot.lane.b32.xlu1 %v791_v52, %s1315_s27 }
 0x3ba   : > { %v769_v53 = vpop.permute.xlu0 %768 }
 0x3bb   : > { %775 = vst.msk [vmem:[%s1579_s19] sm:$0xff] %vm774_vm5, %v769_v53 }
 0x3bc   : > { %v771_v54 = vpop.permute.xlu1 %770 }
 0x3bd   : > { %776 = vst.msk [vmem:[%s1579_s19 + $0x8] sm:$0xff] %vm774_vm5, %v771_v54 }
 0x3be   : > { %v795_v56 = vpop.permute.xlu0 %794 }
 0x3c0   : > { %v782_v55 = vpop.permute.xlu1 %781 }
 0x3c1   : > { %788 = vst.msk [vmem:[%s1579_s19] sm:$0xff] %vm787_vm6, %v782_v55 }
 0x3c2   : > { %801 = vst.msk [vmem:[%s1579_s19] sm:$0xff] %vm800_vm7, %v795_v56 }
 0x3c4   : > { %v784_v57 = vpop.permute.xlu1 %783 }
 0x3c5   : > { %789 = vst.msk [vmem:[%s1579_s19 + $0x8] sm:$0xff] %vm787_vm6, %v784_v57 }
 0x3c8   : > { %v797_v58 = vpop.permute.xlu1 %796 }
 0x3c9   : > { %802 = vst.msk [vmem:[%s1579_s19 + $0x8] sm:$0xff] %vm800_vm7, %v797_v58 }
 0x3ca   : > { %1243 = shalt.err (!%p1240_p5)
}
 0x3cb   : > { %s1244_s11 = scalar_lea.hbm %s1601_s14, 256  ;;  %s1248_s27 = scalar_lea.hbm %s1660_s6, 512 }
 0x3cc   : > { %p1245_p6 = scmp.ne.s32.totalorder %s1601_s14, %s1244_s11  ;;  %p1249_p10 = scmp.lt.u32.totalorder %s1601_s14, %s1660_s6 }
 0x3cd   : > { %p1250_p11 = scmp.lt.u32.totalorder %s1248_s27, %s1244_s11  ;;  %p1252_p13 = scmp.lt.u32.totalorder %s1244_s11, %s1601_s14 }
 0x3ce   : > { %p1246_p7 = pnand %p1245_p6, %p1395_p4 }
 0x3cf   : > { %p1251_p12 = por %p1250_p11, %p1249_p10 }
 0x3d0   : > { %p1247_p9 = pneg %p1246_p7 }
 0x3d1   : > { %p1253_p0 = por %p1252_p13, %p1251_p12 }
 0x3d3   : > { %p1254_p1 = pnand %p1253_p0, %p1247_p9 }
 0x3d5   : > { %1257 = shalt.err (!%p1254_p1)
}
 0x3d6   : > { %s1318_s12 = smov 128   ;;  %s1319_s13 = smov 8  }
 0x3d7   : > { %1150 = dma.vmem_to_hbm [thread:$0]  (%p1395_p4), %s1603_s8, 256, %s1601_s14, %s1608_s15, %s1318_s12, %s1318_s12, %s1319_s13  }
 0x3d8 PF: > { %p1156_p2 = scmp.ge.s32.totalorder %s1308_s26, 2  ;;  %s834_s16 = sand.u32 1, %s1288_s21  }
 0x3d9   : > { %s835_s24 = scalar_lea.sflag [#allocation3], %s834_s16 }
 0x3da   : > { %p1153_p3 = pnand %p1156_p2, %p1402_p8 }
 0x3dc   : > { %1283 = dma.done.wait (!%p1153_p3), %s835_s24, 256  }
 0x3dd   : > { %1285 = vsyncadd (!%p1153_p3), %s835_s24, 4294967040  ;;  %s19_s26 = sadd.s32 1, %s1308_s26   ;;  %s1665_s21 = smov %s1292_s22 }
 0x3de   : > { %p16_p5 = scmp.ge.s32.totalorder %s19_s26, 4   ;;  %s1666_s22 = smov %s1296_s23 }
 0x3df   : > { %s1667_s23 = smov %s1408_s10  ;;  %s1668_s24 = smov %s1304_s25 }
 0x3e0   : > { %s1669_s25 = smov %s1671_s29  ;;  %18 = sbr.rel (!%p16_p5) target bundleno = 4 (0x4), region = 88 }
 0x3e7   :  { %840 = vsyncpa [#allocation3], 1 }
 0x3e8   :  { %842 = vsyncpa [#allocation3 + $0x1], 1 }

// kernel: attn_flow.2
= control target key start
LH: loop header
LB: loop body
LE: loop exit
PB: predicated region body
PF: predicated region fallthrough
CT: control target
= control target key end

     0   :  { %s1261_s18 = smov 0   ;;  %s1582_s0 = inlined_call_operand.vmem [shape: f32[2,16,32], index: 0, kind: input, shape index: {}]   ;;  %s1583_s1 = inlined_call_operand.vmem [shape: f32[2,128,32], index: 1, kind: input, shape index: {}]   ;;  %s1584_s2 = inlined_call_operand.vmem [shape: f32[2,1,16], index: 2, kind: input, shape index: {}]   ;;  %s1585_s3 = inlined_call_operand.vmem [shape: f32[1,32], index: 3, kind: input, shape index: {}]   ;;  %s1586_s4 = inlined_call_operand.vmem [shape: f32[1,32], index: 4, kind: input, shape index: {}]   ;;  %s1587_s5 = inlined_call_operand.vmem [shape: bf16[2,128,32], index: 5, kind: output, shape index: {}]  }
   0x1 LB: > { %s1006_s19 = sadd.s32 4294967295, %s1225_s18   ;;  %p1010_p0 = scmp.ge.s32.totalorder %s1225_s18, 1  ;;  %s1225_s18 = sphi %s1261_s18, %s15_s18  }
   0x2   : > { %p205_p1 = scmp.lt.s32.totalorder %s1225_s18, 3 }
   0x4   : > { %p206_p2 = pnand %p1010_p0, %p205_p1 }
   0x5   : > { %p241_p3 = scmp.lt.s32.totalorder (!%p206_p2), %s1006_s19, 1  ;;  %v1227_v0 = vmov (!%p206_p2), 0.0|0.0   ;;  %vm312_vm0 = vcmask (!%p206_p2), 261120   ;;  %vm1228_vm1 = vmmov (!%p206_p2), 0   ;;  %v1229_v1 = vmov (!%p206_p2), 0.0  }
   0x6   : > { %209 = sbr.rel (%p206_p2) target bundleno = 809 (0x329), region = 40  ;;  %1138 = vmatprep.subr.bf16.mxu0 (!%p206_p2), %v1227_v0  ;;  %1099 = vmatprep.mubr.msk.f32.mxu0 (!%p206_p2), %vm1228_vm1, %v1229_v1  ;;  %v1017_v2 = vld [vmem:[%s1586_s4] ss:$0 sm:$0xff] (!%p206_p2)  ;;  %vm1140_vm2 = vmpackc.low (!%p206_p2), %vm312_vm0, %vm312_vm0  ;;  %v393_v48 = vlaneseq (!%p206_p2)  ;;  %v1230_v52 = vmov (!%p206_p2), 0   ;;  %vm543_vm5 = vcmask (!%p206_p2), 130048   ;;  %vm913_vm6 = vcmask (!%p206_p2), 257024  }
   0x7   : > { %v279_v20 = vld [vmem:[%s1585_s3] sm:$0x1] (!%p206_p2) }
   0x8   : > { %v394_v50 = vshrl.u32 (!%p206_p2), %v393_v48, 7 }
   0xa   : > { %v395_v51 = vsub.s32 (!%p206_p2), 0, %v394_v50 }
   0xd   : > { %s1589_s19 = smov (!%p241_p3, %s1006_s19), 1 }
   0xe   : > { %s1055_s20 = sshll.u32 %s1589_s19, 4  ;;  %s1056_s21 = sshll.u32 %s1589_s19, 7 }
   0xf   : > { %s245_s26 = scalar_lea.vmem %s1582_s0, %s1055_s20  ;;  %s1282_s29 = scalar_lea.vmem %s1583_s1, %s1056_s21 }
  0x10   : > { %v260_v3 = vld [vmem:[%s245_s26] sm:$0xff]  ;;  %v261_v4 = vld [vmem:[%s245_s26 + $0x8] sm:$0xff]  ;;  %v264_v9 = vld [vmem:[%s1282_s29 + $0x10] sm:$0xff]  ;;  %s253_s9 = scalar_lea.vmem %s1584_s2, %s1589_s19  ;;  %s1057_s10 = sshll.u32 %s1589_s19, 6 }
  0x11   : > { %v262_v5 = vld [vmem:[%s1282_s29] sm:$0xff]  ;;  %v281_v6 = vpack.c.bf16 %v261_v4, %v260_v3  ;;  %v263_v7 = vld [vmem:[%s1282_s29 + $0x8] sm:$0xff]  ;;  %v265_v11 = vld [vmem:[%s1282_s29 + $0x18] sm:$0xff]  ;;  %v290_v15 = vmul.f32 %v1017_v2, %v264_v9  ;;  %s1545_s13 = scalar_lea.vmem %s1587_s5, %s1057_s10 }
  0x12   : > { %v288_v8 = vmul.f32 %v1017_v2, %v262_v5  ;;  %v289_v10 = vmul.f32 %v1017_v2, %v263_v7  ;;  %v266_v12 = vld [vmem:[%s1282_s29 + $0x20] sm:$0xff]  ;;  %v267_v13 = vld [vmem:[%s1282_s29 + $0x28] sm:$0xff]  ;;  %v291_v16 = vmul.f32 %v1017_v2, %v265_v11  ;;  %v268_v23 = vld [vmem:[%s1282_s29 + $0x30] sm:$0xff] }
  0x13   : > { %1141 = vmatpush3.bf16.xpose.msk.msra.mxu0 %vm1140_vm2, %v281_v6  ;;  %1142 = vmatprep.subr.msk.bf16.mxu1 %vm312_vm0, %v281_v6  ;;  %v422_v14 = vsel %vm312_vm0, %v281_v6, 0  ;;  %v292_v18 = vmul.f32 %v1017_v2, %v266_v12  ;;  %v293_v19 = vmul.f32 %v1017_v2, %v267_v13  ;;  %v269_v24 = vld [vmem:[%s1282_s29 + $0x38] sm:$0xff]  ;;  %v270_v25 = vld [vmem:[%s1282_s29 + $0x40] sm:$0xff]  ;;  %v271_v26 = vld [vmem:[%s1282_s29 + $0x48] sm:$0xff]  ;;  %v294_v27 = vmul.f32 %v1017_v2, %v268_v23 }
  0x14   : > { %1103 = vmatpush3.bf16.xpose.msra.mxu1 %v422_v14  ;;  %v304_v17 = vpack.c.bf16 %v289_v10, %v288_v8  ;;  %1120 = vmatprep.subr.bf16.mxu0 %v281_v6  ;;  %v305_v21 = vpack.c.bf16 %v291_v16, %v290_v15  ;;  %v295_v28 = vmul.f32 %v1017_v2, %v269_v24  ;;  %v272_v33 = vld [vmem:[%s1282_s29 + $0x50] sm:$0xff]  ;;  %v273_v34 = vld [vmem:[%s1282_s29 + $0x58] sm:$0xff]  ;;  %v274_v35 = vld [vmem:[%s1282_s29 + $0x60] sm:$0xff] }
  0x15   : > { %v306_v22 = vpack.c.bf16 %v293_v19, %v292_v18  ;;  %v296_v29 = vmul.f32 %v1017_v2, %v270_v25  ;;  %v297_v30 = vmul.f32 %v1017_v2, %v271_v26  ;;  %v275_v36 = vld [vmem:[%s1282_s29 + $0x68] sm:$0xff]  ;;  %v298_v37 = vmul.f32 %v1017_v2, %v272_v33  ;;  %v276_v43 = vld [vmem:[%s1282_s29 + $0x70] sm:$0xff]  ;;  %v277_v44 = vld [vmem:[%s1282_s29 + $0x78] sm:$0xff] }
  0x16   : > { %1104 = vmatprep.mubr.msk.bf16.mxu1 %vm312_vm0, %v304_v17  ;;  %v307_v31 = vpack.c.bf16 %v295_v28, %v294_v27  ;;  %v299_v38 = vmul.f32 %v1017_v2, %v273_v34  ;;  %v300_v39 = vmul.f32 %v1017_v2, %v274_v35  ;;  %v301_v40 = vmul.f32 %v1017_v2, %v275_v36  ;;  %v278_v49 = vld [vmem:[%s253_s9] sm:$0x1] }
  0x17   : > { %v308_v32 = vpack.c.bf16 %v297_v30, %v296_v29  ;;  %v302_v45 = vmul.f32 %v1017_v2, %v276_v43  ;;  %v303_v46 = vmul.f32 %v1017_v2, %v277_v44  ;;  %vm392_vm3 = vcmp.gt.f32.partialorder %v278_v49, 0.0 }
  0x18   : > { %v309_v41 = vpack.c.bf16 %v299_v38, %v298_v37  ;;  %v310_v42 = vpack.c.bf16 %v301_v40, %v300_v39  ;;  %v521_v53 = vsel %vm392_vm3, 1, %v1230_v52 }
  0x19   : > { %v311_v47 = vpack.c.bf16 %v303_v46, %v302_v45  ;;  %v1320_v54 = vrot.slane %v521_v53, %v395_v51 }
  0x1a   : > { %1100 = vmatmul.mubr.msk.f32.vlgmr.msra.gmra.mrb[0].mxu0 %vm312_vm0, %v279_v20 }
  0x1b   : > { %1105 = vmatmul.mubr.msk.bf16.vlgmr.msra.gmra.mrb[0].mxu1 %vm312_vm0, %v305_v21  ;;  %1121 = vmatpush3.bf16.msra.mxu0 %v281_v6  ;;  %vm526_vm4 = vcmp.eq.s32.totalorder %v1320_v54, 1 }
  0x1c   : > { %1108 = vmatprep.mubr.msk.bf16.mxu1 %vm312_vm0, %v306_v22 }
  0x23   : > { %1109 = vmatmul.mubr.msk.bf16.gmra.mrb[4].mxu1 %vm312_vm0, %v307_v31 }
  0x24   : > { %1112 = vmatprep.mubr.msk.bf16.mxu1 %vm312_vm0, %v308_v32 }
  0x2b   : > { %1113 = vmatmul.mubr.msk.bf16.gmra.mrb[8].mxu1 %vm312_vm0, %v309_v41 }
  0x2c   : > { %1116 = vmatprep.mubr.msk.bf16.mxu1 %vm312_vm0, %v310_v42 }
  0x33   : > { %1117 = vmatmul.mubr.msk.bf16.gmra.mrb[12].mxu1 %vm312_vm0, %v311_v47 }
  0xed   : > { %v388_v55 = vpop.f32.mrb[0].mxu0 }
  0xee   : > { %v1322_v56 = vrot.slane %v388_v55, %v395_v51  ;;  %v1101_v57 = vpop.f32.mrb[1].mxu0  ;;  %v1106_v58 = vpop.f32.mrb[0].mxu1 }
  0xef   : > { %v458_v59 = vpop.f32.mrb[1].mxu1 }
  0xf0   : > { %v467_v60 = vadd.f32 %v1106_v58, %v1322_v56  ;;  %v459_v61 = vadd.f32 %v458_v59, %v1322_v56  ;;  %v1107_v62 = vpop.f32.mrb[2].mxu1 }
  0xf1   : > { %v470_v63 = vadd.f32 %v1107_v62, %v1322_v56  ;;  %v461_v0 = vpop.f32.mrb[3].mxu1 }
  0xf2   : > { %v462_v1 = vadd.f32 %v461_v0, %v1322_v56  ;;  %v1331_v2 = vsel %vm526_vm4, %v467_v60, -1e+30  ;;  %v1335_v3 = vsel %vm526_vm4, %v459_v61, -1e+30 }
  0xf3   : > { %v550_v4 = vsel %vm543_vm5, %v1331_v2, -inf  ;;  %v544_v5 = vsel %vm543_vm5, %v1335_v3, -inf  ;;  %v1343_v6 = vsel %vm526_vm4, %v470_v63, -1e+30 }
  0xf4   : > { %551 = vmax.xlane.f32.xlu1 %v550_v4  ;;  %545 = vmax.xlane.f32.xlu0 %v544_v5  ;;  %v1347_v7 = vsel %vm526_vm4, %v462_v1, -1e+30  ;;  %v553_v11 = vsel %vm543_vm5, %v1343_v6, -inf }
  0xf5   : > { %v547_v12 = vsel %vm543_vm5, %v1347_v7, -inf }
  0xf6   : > { %v1110_v8 = vpop.f32.mrb[4].mxu1 }
  0xf7   : > { %v483_v9 = vadd.f32 %v1110_v8, %v1322_v56  ;;  %v474_v10 = vpop.f32.mrb[5].mxu1 }
  0xf8   : > { %v475_v13 = vadd.f32 %v474_v10, %v1322_v56  ;;  %v1111_v14 = vpop.f32.mrb[6].mxu1  ;;  %554 = vmax.xlane.f32.xlu1 %v553_v11  ;;  %548 = vmax.xlane.f32.xlu0 %v547_v12 }
  0xf9   : > { %v486_v15 = vadd.f32 %v1111_v14, %v1322_v56  ;;  %v477_v16 = vpop.f32.mrb[7].mxu1  ;;  %v1358_v17 = vsel %vm526_vm4, %v483_v9, -1e+30 }
  0xfa   : > { %v478_v18 = vadd.f32 %v477_v16, %v1322_v56  ;;  %v1363_v19 = vsel %vm526_vm4, %v475_v13, -1e+30  ;;  %v562_v27 = vsel %vm543_vm5, %v1358_v17, -inf }
  0xfb   : > { %v556_v20 = vsel %vm543_vm5, %v1363_v19, -inf  ;;  %v1369_v21 = vsel %vm526_vm4, %v486_v15, -1e+30 }
  0xfc   : > { %557 = vmax.xlane.f32.xlu0 %v556_v20  ;;  %v1373_v22 = vsel %vm526_vm4, %v478_v18, -1e+30  ;;  %v565_v32 = vsel %vm543_vm5, %v1369_v21, -inf }
  0xfd   : > { %v559_v23 = vsel %vm543_vm5, %v1373_v22, -inf }
  0xfe   : > { %v1114_v24 = vpop.f32.mrb[8].mxu1  ;;  %560 = vmax.xlane.f32.xlu1 %v559_v23 }
  0xff   : > { %v499_v25 = vadd.f32 %v1114_v24, %v1322_v56  ;;  %v490_v26 = vpop.f32.mrb[9].mxu1 }
 0x100   : > { %v491_v28 = vadd.f32 %v490_v26, %v1322_v56  ;;  %v1115_v29 = vpop.f32.mrb[10].mxu1  ;;  %563 = vmax.xlane.f32.xlu0 %v562_v27 }
 0x101   : > { %v502_v30 = vadd.f32 %v1115_v29, %v1322_v56  ;;  %v493_v31 = vpop.f32.mrb[11].mxu1  ;;  %v1386_v33 = vsel %vm526_vm4, %v499_v25, -1e+30 }
 0x102   : > { %v494_v34 = vadd.f32 %v493_v31, %v1322_v56  ;;  %566 = vmax.xlane.f32.xlu1 %v565_v32  ;;  %v1391_v35 = vsel %vm526_vm4, %v491_v28, -1e+30  ;;  %v574_v43 = vsel %vm543_vm5, %v1386_v33, -inf }
 0x103   : > { %v568_v36 = vsel %vm543_vm5, %v1391_v35, -inf  ;;  %v1397_v37 = vsel %vm526_vm4, %v502_v30, -1e+30 }
 0x104   : > { %569 = vmax.xlane.f32.xlu0 %v568_v36  ;;  %v1401_v38 = vsel %vm526_vm4, %v494_v34, -1e+30  ;;  %v577_v48 = vsel %vm543_vm5, %v1397_v37, -inf }
 0x105   : > { %v571_v39 = vsel %vm543_vm5, %v1401_v38, -inf }
 0x106   : > { %v1118_v40 = vpop.f32.mrb[12].mxu1  ;;  %572 = vmax.xlane.f32.xlu1 %v571_v39 }
 0x107   : > { %v515_v41 = vadd.f32 %v1118_v40, %v1322_v56  ;;  %v506_v42 = vpop.f32.mrb[13].mxu1 }
 0x108   : > { %v507_v44 = vadd.f32 %v506_v42, %v1322_v56  ;;  %v1119_v45 = vpop.f32.mrb[14].mxu1  ;;  %575 = vmax.xlane.f32.xlu0 %v574_v43 }
 0x109   : > { %v518_v46 = vadd.f32 %v1119_v45, %v1322_v56  ;;  %v509_v47 = vpop.f32.mrb[15].mxu1  ;;  %v1414_v49 = vsel %vm526_vm4, %v515_v41, -1e+30 }
 0x10a   : > { %v510_v50 = vadd.f32 %v509_v47, %v1322_v56  ;;  %578 = vmax.xlane.f32.xlu1 %v577_v48  ;;  %v1419_v51 = vsel %vm526_vm4, %v507_v44, -1e+30  ;;  %v586_v57 = vsel %vm543_vm5, %v1414_v49, -inf }
 0x10b   : > { %v580_v52 = vsel %vm543_vm5, %v1419_v51, -inf  ;;  %v1425_v53 = vsel %vm526_vm4, %v518_v46, -1e+30 }
 0x10c   : > { %581 = vmax.xlane.f32.xlu0 %v580_v52  ;;  %v1429_v55 = vsel %vm526_vm4, %v510_v50, -1e+30  ;;  %v589_v58 = vsel %vm543_vm5, %v1425_v53, -inf }
 0x10d   : > { %v583_v56 = vsel %vm543_vm5, %v1429_v55, -inf }
 0x10e   : > { %584 = vmax.xlane.f32.xlu1 %v583_v56 }
 0x110   : > { %587 = vmax.xlane.f32.xlu0 %v586_v57 }
 0x112   : > { %590 = vmax.xlane.f32.xlu1 %v589_v58 }
 0x181   : > { %v552_v59 = vpop.xlane.xlu1 %551  ;;  %v546_v60 = vpop.xlane.xlu0 %545 }
 0x182   : > { %v594_v61 = vsub.f32 %v1331_v2, %v552_v59  ;;  %v592_v54 = vsub.f32 %v1335_v3, %v546_v60 }
 0x184   : > { %v612_v62 = vmul.f32 1.442695, %v594_v61  ;;  %v608_v63 = vmul.f32 1.442695, %v592_v54 }
 0x185   : > { %v555_v0 = vpop.xlane.xlu1 %554  ;;  %v549_v1 = vpop.xlane.xlu0 %548 }
 0x186   : > { %v595_v4 = vsub.f32 %v1343_v6, %v555_v0  ;;  %v593_v5 = vsub.f32 %v1347_v7, %v549_v1  ;;  %1155 = vpow2.f32 %v608_v63 }
 0x187   : > { %1157 = vpow2.f32 %v612_v62 }
 0x188   : > { %v610_v8 = vmul.f32 1.442695, %v593_v5  ;;  %v614_v9 = vmul.f32 1.442695, %v595_v4 }
 0x189   : > { %v558_v10 = vpop.xlane.xlu0 %557 }
 0x18a   : > { %v596_v11 = vsub.f32 %v1363_v19, %v558_v10  ;;  %1159 = vpow2.f32 %v610_v8 }
 0x18b   : > { %v561_v12 = vpop.xlane.xlu1 %560  ;;  %1161 = vpow2.f32 %v614_v9 }
 0x18c   : > { %v616_v2 = vmul.f32 1.442695, %v596_v11  ;;  %v597_v3 = vsub.f32 %v1373_v22, %v561_v12 }
 0x18d   : > { %v564_v13 = vpop.xlane.xlu0 %563 }
 0x18e   : > { %1163 = vpow2.f32 %v616_v2  ;;  %v618_v14 = vmul.f32 1.442695, %v597_v3  ;;  %v598_v6 = vsub.f32 %v1358_v17, %v564_v13 }
 0x18f   : > { %v567_v15 = vpop.xlane.xlu1 %566 }
 0x190   : > { %v620_v7 = vmul.f32 1.442695, %v598_v6  ;;  %v599_v16 = vsub.f32 %v1369_v21, %v567_v15  ;;  %v1445_v18 = vpop.eup %1155  ;;  %1165 = vpow2.f32 %v618_v14 }
 0x191   : > { %v570_v20 = vpop.xlane.xlu0 %569  ;;  %v1447_v19 = vpop.eup %1157  ;;  %v640_v24 = vsel %vm543_vm5, %v1445_v18, 0.0 }
 0x192   : > { %1167 = vpow2.f32 %v620_v7  ;;  %v622_v23 = vmul.f32 1.442695, %v599_v16  ;;  %v600_v22 = vsub.f32 %v1391_v35, %v570_v20  ;;  %641 = vadd.xlane.f32.xlu0 %v640_v24  ;;  %v646_v28 = vsel %vm543_vm5, %v1447_v19, 0.0 }
 0x193   : > { %v573_v25 = vpop.xlane.xlu1 %572 }
 0x194   : > { %v624_v17 = vmul.f32 1.442695, %v600_v22  ;;  %v601_v26 = vsub.f32 %v1401_v38, %v573_v25  ;;  %v1453_v27 = vpop.eup %1159  ;;  %1169 = vpow2.f32 %v622_v23 }
 0x195   : > { %v576_v21 = vpop.xlane.xlu0 %575  ;;  %v643_v31 = vsel %vm543_vm5, %v1453_v27, 0.0  ;;  %v1460_v32 = vpop.eup %1161 }
 0x196   : > { %1171 = vpow2.f32 %v624_v17  ;;  %v626_v29 = vmul.f32 1.442695, %v601_v26  ;;  %v602_v30 = vsub.f32 %v1386_v33, %v576_v21  ;;  %647 = vadd.xlane.f32.xlu0 %v646_v28  ;;  %644 = vadd.xlane.f32.xlu1 %v643_v31  ;;  %v649_v42 = vsel %vm543_vm5, %v1460_v32, 0.0 }
 0x197   : > { %v579_v34 = vpop.xlane.xlu1 %578 }
 0x198   : > { %v1462_v35 = vpop.eup %1163  ;;  %v628_v36 = vmul.f32 1.442695, %v602_v30  ;;  %v603_v38 = vsub.f32 %v1397_v37, %v579_v34  ;;  %1173 = vpow2.f32 %v626_v29 }
 0x199   : > { %v582_v39 = vpop.xlane.xlu0 %581  ;;  %v652_v40 = vsel %vm543_vm5, %v1462_v35, 0.0 }
 0x19a   : > { %1175 = vpow2.f32 %v628_v36  ;;  %v630_v33 = vmul.f32 1.442695, %v603_v38  ;;  %v604_v41 = vsub.f32 %v1419_v51, %v582_v39  ;;  %v1470_v43 = vpop.eup %1165  ;;  %650 = vadd.xlane.f32.xlu1 %v649_v42  ;;  %653 = vadd.xlane.f32.xlu0 %v652_v40 }
 0x19b   : > { %v585_v44 = vpop.xlane.xlu1 %584  ;;  %v655_v52 = vsel %vm543_vm5, %v1470_v43, 0.0 }
 0x19c   : > { %v1472_v45 = vpop.eup %1167  ;;  %v632_v37 = vmul.f32 1.442695, %v604_v41  ;;  %v605_v46 = vsub.f32 %v1429_v55, %v585_v44  ;;  %1177 = vpow2.f32 %v630_v33 }
 0x19d   : > { %v588_v47 = vpop.xlane.xlu0 %587  ;;  %v658_v48 = vsel %vm543_vm5, %v1472_v45, 0.0 }
 0x19e   : > { %1179 = vpow2.f32 %v632_v37  ;;  %v634_v50 = vmul.f32 1.442695, %v605_v46  ;;  %v606_v51 = vsub.f32 %v1414_v49, %v588_v47  ;;  %v1480_v56 = vpop.eup %1169  ;;  %656 = vadd.xlane.f32.xlu1 %v655_v52  ;;  %659 = vadd.xlane.f32.xlu0 %v658_v48 }
 0x19f   : > { %v591_v57 = vpop.xlane.xlu1 %590  ;;  %v661_v49 = vsel %vm543_vm5, %v1480_v56, 0.0 }
 0x1a0   : > { %v1482_v58 = vpop.eup %1171  ;;  %v636_v55 = vmul.f32 1.442695, %v606_v51  ;;  %v607_v59 = vsub.f32 %v1425_v53, %v591_v57  ;;  %1181 = vpow2.f32 %v634_v50 }
 0x1a1   : > { %v664_v60 = vsel %vm543_vm5, %v1482_v58, 0.0 }
 0x1a2   : > { %1183 = vpow2.f32 %v636_v55  ;;  %v638_v61 = vmul.f32 1.442695, %v607_v59  ;;  %v1489_v54 = vpop.eup %1173  ;;  %662 = vadd.xlane.f32.xlu1 %v661_v49  ;;  %665 = vadd.xlane.f32.xlu0 %v664_v60 }
 0x1a3   : > { %v667_v53 = vsel %vm543_vm5, %v1489_v54, 0.0 }
 0x1a4   : > { %v1491_v62 = vpop.eup %1175  ;;  %1185 = vpow2.f32 %v638_v61 }
 0x1a5   : > { %v670_v63 = vsel %vm543_vm5, %v1491_v62, 0.0 }
 0x1a6   : > { %v1497_v0 = vpop.eup %1177  ;;  %668 = vadd.xlane.f32.xlu1 %v667_v53  ;;  %671 = vadd.xlane.f32.xlu0 %v670_v63 }
 0x1a7   : > { %v673_v5 = vsel %vm543_vm5, %v1497_v0, 0.0 }
 0x1a8   : > { %v1499_v1 = vpop.eup %1179 }
 0x1a9   : > { %v676_v4 = vsel %vm543_vm5, %v1499_v1, 0.0 }
 0x1aa   : > { %v1505_v8 = vpop.eup %1181  ;;  %674 = vadd.xlane.f32.xlu1 %v673_v5  ;;  %677 = vadd.xlane.f32.xlu0 %v676_v4 }
 0x1ab   : > { %v679_v11 = vsel %vm543_vm5, %v1505_v8, 0.0 }
 0x1ac   : > { %v1507_v9 = vpop.eup %1183 }
 0x1ad   : > { %v682_v10 = vsel %vm543_vm5, %v1507_v9, 0.0 }
 0x1ae   : > { %v1513_v12 = vpop.eup %1185  ;;  %680 = vadd.xlane.f32.xlu1 %v679_v11  ;;  %683 = vadd.xlane.f32.xlu0 %v682_v10 }
 0x1af   : > { %v685_v2 = vsel %vm543_vm5, %v1513_v12, 0.0 }
 0x1b2   : > { %686 = vadd.xlane.f32.xlu1 %v685_v2 }
 0x21f   : > { %v642_v3 = vpop.xlane.xlu0 %641 }
 0x220   : > { %1187 = vrcp.f32 %v642_v3 }
 0x223   : > { %v645_v13 = vpop.xlane.xlu1 %644  ;;  %v648_v14 = vpop.xlane.xlu0 %647 }
 0x224   : > { %1189 = vrcp.f32 %v645_v13 }
 0x225   : > { %1191 = vrcp.f32 %v648_v14 }
 0x227   : > { %v651_v6 = vpop.xlane.xlu1 %650  ;;  %v654_v15 = vpop.xlane.xlu0 %653 }
 0x228   : > { %1193 = vrcp.f32 %v651_v6 }
 0x229   : > { %1195 = vrcp.f32 %v654_v15 }
 0x22a   : > { %v1188_v20 = vpop.eup %1187 }
 0x22b   : > { %v657_v7 = vpop.xlane.xlu1 %656  ;;  %v660_v16 = vpop.xlane.xlu0 %659  ;;  %v689_v25 = vmul.f32 %v1188_v20, %v1445_v18 }
 0x22c   : > { %1197 = vrcp.f32 %v657_v7 }
 0x22d   : > { %1199 = vrcp.f32 %v660_v16 }
 0x22e   : > { %v1190_v23 = vpop.eup %1189 }
 0x22f   : > { %v663_v22 = vpop.xlane.xlu1 %662  ;;  %v666_v24 = vpop.xlane.xlu0 %665  ;;  %v691_v17 = vmul.f32 %v1190_v23, %v1453_v27 }
 0x230   : > { %v1192_v26 = vpop.eup %1191  ;;  %1201 = vrcp.f32 %v663_v22 }
 0x231   : > { %v720_v21 = vpack.c.bf16 %v691_v17, %v689_v25  ;;  %1203 = vrcp.f32 %v666_v24  ;;  %v693_v29 = vmul.f32 %v1192_v26, %v1447_v19 }
 0x232   : > { %v1194_v28 = vpop.eup %1193 }
 0x233   : > { %v695_v30 = vmul.f32 %v1194_v28, %v1460_v32  ;;  %v669_v31 = vpop.xlane.xlu1 %668  ;;  %1122 = vmatprep.mubr.msk.bf16.mxu0 %vm543_vm5, %v720_v21  ;;  %v672_v34 = vpop.xlane.xlu0 %671 }
 0x234   : > { %v1196_v36 = vpop.eup %1195  ;;  %1205 = vrcp.f32 %v669_v31 }
 0x235   : > { %v721_v38 = vpack.c.bf16 %v695_v30, %v693_v29  ;;  %1207 = vrcp.f32 %v672_v34  ;;  %v697_v40 = vmul.f32 %v1196_v36, %v1462_v35 }
 0x236   : > { %v1198_v39 = vpop.eup %1197 }
 0x237   : > { %v675_v18 = vpop.xlane.xlu1 %674  ;;  %1123 = vmatmul.mubr.msk.bf16.vlgmr.msra.gmra.mrb[4].mxu0 %vm543_vm5, %v721_v38  ;;  %v678_v27 = vpop.xlane.xlu0 %677  ;;  %v699_v33 = vmul.f32 %v1198_v39, %v1470_v43 }
 0x238   : > { %v1200_v19 = vpop.eup %1199  ;;  %1209 = vrcp.f32 %v675_v18 }
 0x239   : > { %v722_v32 = vpack.c.bf16 %v699_v33, %v697_v40  ;;  %1211 = vrcp.f32 %v678_v27  ;;  %v701_v37 = vmul.f32 %v1200_v19, %v1472_v45 }
 0x23a   : > { %v1202_v41 = vpop.eup %1201 }
 0x23b   : > { %v681_v42 = vpop.xlane.xlu1 %680  ;;  %1126 = vmatprep.mubr.msk.bf16.mxu0 %vm543_vm5, %v722_v32  ;;  %v684_v44 = vpop.xlane.xlu0 %683  ;;  %v703_v46 = vmul.f32 %v1202_v41, %v1480_v56 }
 0x23c   : > { %v1204_v47 = vpop.eup %1203  ;;  %1213 = vrcp.f32 %v681_v42 }
 0x23d   : > { %v723_v48 = vpack.c.bf16 %v703_v46, %v701_v37  ;;  %1215 = vrcp.f32 %v684_v44  ;;  %v705_v43 = vmul.f32 %v1204_v47, %v1482_v58 }
 0x23e   : > { %v1206_v50 = vpop.eup %1205 }
 0x23f   : > { %v687_v35 = vpop.xlane.xlu1 %686  ;;  %1127 = vmatmul.mubr.msk.bf16.gmra.mrb[8].mxu0 %vm543_vm5, %v723_v48  ;;  %v707_v51 = vmul.f32 %v1206_v50, %v1489_v54  ;;  %v1208_v52 = vpop.eup %1207 }
 0x240   : > { %1217 = vrcp.f32 %v687_v35  ;;  %v709_v45 = vmul.f32 %v1208_v52, %v1491_v62 }
 0x241   : > { %v724_v57 = vpack.c.bf16 %v707_v51, %v705_v43 }
 0x242   : > { %v1210_v55 = vpop.eup %1209 }
 0x243   : > { %1130 = vmatprep.mubr.msk.bf16.mxu0 %vm543_vm5, %v724_v57  ;;  %v711_v56 = vmul.f32 %v1210_v55, %v1497_v0  ;;  %v1212_v59 = vpop.eup %1211 }
 0x244   : > { %v713_v58 = vmul.f32 %v1212_v59, %v1499_v1 }
 0x245   : > { %v725_v60 = vpack.c.bf16 %v711_v56, %v709_v45 }
 0x246   : > { %v1214_v61 = vpop.eup %1213 }
 0x247   : > { %1131 = vmatmul.mubr.msk.bf16.gmra.mrb[12].mxu0 %vm543_vm5, %v725_v60  ;;  %v715_v49 = vmul.f32 %v1214_v61, %v1505_v8  ;;  %v1216_v54 = vpop.eup %1215 }
 0x248   : > { %v717_v4 = vmul.f32 %v1216_v54, %v1507_v9 }
 0x249   : > { %v726_v63 = vpack.c.bf16 %v715_v49, %v713_v58 }
 0x24a   : > { %v1218_v53 = vpop.eup %1217 }
 0x24b   : > { %1134 = vmatprep.mubr.msk.bf16.mxu0 %vm543_vm5, %v726_v63  ;;  %v719_v62 = vmul.f32 %v1218_v53, %v1513_v12 }
 0x24d   : > { %v727_v5 = vpack.c.bf16 %v719_v62, %v717_v4 }
 0x24f   : > { %1135 = vmatmul.mubr.msk.bf16.gmra.mrb[16].mxu0 %vm543_vm5, %v727_v5 }
 0x30a   : > { %v1124_v0 = vpop.f32.mrb[4].mxu0 }
 0x30b   : > { %v1060_v1 = vpack.c.bf16 %v1124_v0, %v1124_v0  ;;  %v786_v8 = vpop.f32.mrb[5].mxu0 }
 0x30c   : > { %v1058_v9 = vpack.c.bf16 %v786_v8, %v786_v8  ;;  %v1125_v10 = vpop.f32.mrb[6].mxu0 }
 0x30d   : > { %916 = vst.msk [vmem:[%s1545_s13 + $0x8] sm:$0xf] %vm913_vm6, %v1060_v1  ;;  %v1061_v11 = vpack.c.bf16 %v1125_v10, %v1125_v10  ;;  %v789_v12 = vpop.f32.mrb[7].mxu0 }
 0x30e   : > { %914 = vst.msk [vmem:[%s1545_s13] sm:$0xf] %vm913_vm6, %v1058_v9  ;;  %v1059_v2 = vpack.c.bf16 %v789_v12, %v789_v12 }
 0x30f   : > { %917 = vst.msk [vmem:[%s1545_s13 + $0xc] sm:$0xf] %vm913_vm6, %v1061_v11 }
 0x310   : > { %915 = vst.msk [vmem:[%s1545_s13 + $0x4] sm:$0xf] %vm913_vm6, %v1059_v2 }
 0x312   : > { %v1128_v3 = vpop.f32.mrb[8].mxu0 }
 0x313   : > { %v1064_v13 = vpack.c.bf16 %v1128_v3, %v1128_v3  ;;  %v802_v14 = vpop.f32.mrb[9].mxu0 }
 0x314   : > { %v1062_v6 = vpack.c.bf16 %v802_v14, %v802_v14  ;;  %v1129_v15 = vpop.f32.mrb[10].mxu0 }
 0x315   : > { %920 = vst.msk [vmem:[%s1545_s13 + $0x18] sm:$0xf] %vm913_vm6, %v1064_v13  ;;  %v1065_v7 = vpack.c.bf16 %v1129_v15, %v1129_v15  ;;  %v805_v16 = vpop.f32.mrb[11].mxu0 }
 0x316   : > { %918 = vst.msk [vmem:[%s1545_s13 + $0x10] sm:$0xf] %vm913_vm6, %v1062_v6  ;;  %v1063_v20 = vpack.c.bf16 %v805_v16, %v805_v16 }
 0x317   : > { %921 = vst.msk [vmem:[%s1545_s13 + $0x1c] sm:$0xf] %vm913_vm6, %v1065_v7 }
 0x318   : > { %919 = vst.msk [vmem:[%s1545_s13 + $0x14] sm:$0xf] %vm913_vm6, %v1063_v20 }
 0x31a   : > { %v1132_v23 = vpop.f32.mrb[12].mxu0 }
 0x31b   : > { %v1068_v22 = vpack.c.bf16 %v1132_v23, %v1132_v23  ;;  %v818_v24 = vpop.f32.mrb[13].mxu0 }
 0x31c   : > { %v1066_v25 = vpack.c.bf16 %v818_v24, %v818_v24  ;;  %v1133_v17 = vpop.f32.mrb[14].mxu0 }
 0x31d   : > { %924 = vst.msk [vmem:[%s1545_s13 + $0x28] sm:$0xf] %vm913_vm6, %v1068_v22  ;;  %v1069_v26 = vpack.c.bf16 %v1133_v17, %v1133_v17  ;;  %v821_v21 = vpop.f32.mrb[15].mxu0 }
 0x31e   : > { %922 = vst.msk [vmem:[%s1545_s13 + $0x20] sm:$0xf] %vm913_vm6, %v1066_v25  ;;  %v1067_v28 = vpack.c.bf16 %v821_v21, %v821_v21 }
 0x31f   : > { %925 = vst.msk [vmem:[%s1545_s13 + $0x2c] sm:$0xf] %vm913_vm6, %v1069_v26 }
 0x320   : > { %923 = vst.msk [vmem:[%s1545_s13 + $0x24] sm:$0xf] %vm913_vm6, %v1067_v28 }
 0x322   : > { %v1136_v29 = vpop.f32.mrb[16].mxu0 }
 0x323   : > { %v1072_v30 = vpack.c.bf16 %v1136_v29, %v1136_v29  ;;  %v834_v31 = vpop.f32.mrb[17].mxu0 }
 0x324   : > { %v1070_v34 = vpack.c.bf16 %v834_v31, %v834_v31  ;;  %v1137_v36 = vpop.f32.mrb[18].mxu0 }
 0x325   : > { %928 = vst.msk [vmem:[%s1545_s13 + $0x38] sm:$0xf] %vm913_vm6, %v1072_v30  ;;  %v1073_v38 = vpack.c.bf16 %v1137_v36, %v1137_v36  ;;  %v837_v39 = vpop.f32.mrb[19].mxu0 }
 0x326   : > { %926 = vst.msk [vmem:[%s1545_s13 + $0x30] sm:$0xf] %vm913_vm6, %v1070_v34  ;;  %v1071_v18 = vpack.c.bf16 %v837_v39, %v837_v39 }
 0x327   : > { %929 = vst.msk [vmem:[%s1545_s13 + $0x3c] sm:$0xf] %vm913_vm6, %v1073_v38 }
 0x328   : > { %927 = vst.msk [vmem:[%s1545_s13 + $0x34] sm:$0xf] %vm913_vm6, %v1071_v18 }
 0x329 PF: > { %s15_s18 = sadd.s32 1, %s1225_s18  }
 0x32a   : > { %p12_p4 = scmp.ge.s32.totalorder %s15_s18, 4  }
 0x32c   :  { %14 = sbr.rel (!%p12_p4) target bundleno = 1 (0x1), region = 76 }

</bundles_post_ra>
